<compile_context>
chip_gen: v7x
topology: tpu7x:2x2x1
jax: 0.10.0
libtpu: 0.0.40
codegen_flags: <defaults>
</compile_context>

<pallas_src>
import functools

import jax
import jax.numpy as jnp
import numpy as np
from jax.experimental import pallas as pl
from jax.experimental.pallas import tpu as pltpu


# ------------------------------ tiling helper ------------------------------ #

def _pick_tile(dim, cap, align):
    """Largest tile <= cap that divides dim and is a multiple of `align`;
    falls back to the full dimension (always a legal block)."""
    if dim <= cap:
        return dim
    t = cap - (cap % align)
    while t >= align:
        if dim % t == 0:
            return t
        t -= align
    return dim


# ----------------------------- dense (matmul) ------------------------------ #

def _matmul_kernel(x_ref, w_ref, b_ref, o_ref, acc_ref, *, activation):
    @pl.when(pl.program_id(2) == 0)
    def _():
        acc_ref[...] = jnp.zeros_like(acc_ref)

    acc_ref[...] += jnp.dot(x_ref[...], w_ref[...],
                            preferred_element_type=jnp.float32)

    @pl.when(pl.program_id(2) == pl.num_programs(2) - 1)
    def _():
        y = acc_ref[...] + b_ref[...].astype(jnp.float32)
        if activation == "gelu":
            # TODO(synk): HF BERT uses erf-GELU; tanh approximation used here
            # (EUP-friendly), outputs differ slightly from the torch reference.
            y = jax.nn.gelu(y, approximate=True)
        o_ref[...] = y.astype(o_ref.dtype)


def dense(x, w, b, activation=None, out_dtype=jnp.bfloat16,
          tm_cap=256, tn_cap=512, tk_cap=512):
    """x: [M, K] bf16, w: [K, N] bf16, b: [N] f32 -> [M, N] out_dtype."""
    M, K = x.shape
    N = w.shape[1]
    tm = _pick_tile(M, tm_cap, 8)     # second-minor: multiple of 8 (or full)
    tn = _pick_tile(N, tn_cap, 128)   # minor: multiple of 128 (or full)
    tk = _pick_tile(K, tk_cap, 128)
    grid = (M // tm, N // tn, K // tk)
    cost = pl.CostEstimate(
        flops=2 * M * N * K, transcendentals=0,
        bytes_accessed=(M * K + K * N) * np.dtype(x.dtype).itemsize
        + M * N * np.dtype(out_dtype).itemsize)
    return pl.pallas_call(
        functools.partial(_matmul_kernel, activation=activation),
        out_shape=jax.ShapeDtypeStruct((M, N), out_dtype),
        grid=grid,
        in_specs=[
            pl.BlockSpec((tm, tk), lambda i, j, k: (i, k)),
            pl.BlockSpec((tk, tn), lambda i, j, k: (k, j)),
            pl.BlockSpec((1, tn), lambda i, j, k: (0, j)),
        ],
        out_specs=pl.BlockSpec((tm, tn), lambda i, j, k: (i, j)),
        scratch_shapes=[pltpu.VMEM((tm, tn), jnp.float32)],
        compiler_params=pltpu.CompilerParams(
            dimension_semantics=("parallel", "parallel", "arbitrary")),
        cost_estimate=cost,
    )(x, w, b.reshape(1, N))


# -------------------------------- LayerNorm -------------------------------- #

def _ln_math(x, g, b, eps):
    mean = jnp.mean(x, axis=-1, keepdims=True)
    var = jnp.mean(jnp.square(x - mean), axis=-1, keepdims=True)
    inv = jax.lax.rsqrt(var + eps)
    return (x - mean) * inv * g + b


def _ln_kernel(x_ref, g_ref, b_ref, o_ref, *, eps):
    x = x_ref[...].astype(jnp.float32)
    o_ref[...] = _ln_math(x, g_ref[...], b_ref[...], eps).astype(o_ref.dtype)


def _add_ln_kernel(x_ref, r_ref, g_ref, b_ref, o_ref, *, eps):
    x = x_ref[...].astype(jnp.float32) + r_ref[...].astype(jnp.float32)
    o_ref[...] = _ln_math(x, g_ref[...], b_ref[...], eps).astype(o_ref.dtype)


def layernorm(x, gamma, beta, eps=1e-12, out_dtype=jnp.bfloat16):
    N, H = x.shape
    tr = _pick_tile(N, 1024, 8)
    return pl.pallas_call(
        functools.partial(_ln_kernel, eps=eps),
        out_shape=jax.ShapeDtypeStruct((N, H), out_dtype),
        grid=(N // tr,),
        in_specs=[
            pl.BlockSpec((tr, H), lambda i: (i, 0)),
            pl.BlockSpec((1, H), lambda i: (0, 0)),
            pl.BlockSpec((1, H), lambda i: (0, 0)),
        ],
        out_specs=pl.BlockSpec((tr, H), lambda i: (i, 0)),
        compiler_params=pltpu.CompilerParams(dimension_semantics=("parallel",)),
    )(x, gamma.reshape(1, H), beta.reshape(1, H))


def add_layernorm(x, resid, gamma, beta, eps=1e-12, out_dtype=jnp.bfloat16):
    """LayerNorm(x + resid): residual add fused into the kernel (saves one
    full HBM round-trip of the activation per residual)."""
    N, H = x.shape
    tr = _pick_tile(N, 1024, 8)
    return pl.pallas_call(
        functools.partial(_add_ln_kernel, eps=eps),
        out_shape=jax.ShapeDtypeStruct((N, H), out_dtype),
        grid=(N // tr,),
        in_specs=[
            pl.BlockSpec((tr, H), lambda i: (i, 0)),
            pl.BlockSpec((tr, H), lambda i: (i, 0)),
            pl.BlockSpec((1, H), lambda i: (0, 0)),
            pl.BlockSpec((1, H), lambda i: (0, 0)),
        ],
        out_specs=pl.BlockSpec((tr, H), lambda i: (i, 0)),
        compiler_params=pltpu.CompilerParams(dimension_semantics=("parallel",)),
    )(x, resid, gamma.reshape(1, H), beta.reshape(1, H))


# -------------------------------- attention -------------------------------- #

def _attn_kernel(q_ref, k_ref, v_ref, o_ref, *, scale):
    k = k_ref[0]                                                     # (S, Dh) bf16
    v = v_ref[0]
    # Fold 1/sqrt(Dh) into q (S*Dh multiplies instead of S*S).
    q = (q_ref[0].astype(jnp.float32) * scale).astype(k.dtype)
    # q @ k^T without materializing a transpose: contract the last dims.
    s = jax.lax.dot_general(q, k, (((1,), (1,)), ((), ())),
                            preferred_element_type=jnp.float32)      # (S, S) f32
    s = s - jnp.max(s, axis=-1, keepdims=True)
    p = jnp.exp(s)
    inv = pl.reciprocal(jnp.sum(p, axis=-1, keepdims=True), approx=True)
    ctx = jnp.dot(p.astype(v.dtype), v, preferred_element_type=jnp.float32)
    o_ref[0] = (ctx * inv).astype(o_ref.dtype)


def attention(q, k, v):
    """q, k, v: [B*NH, S, Dh] bf16 -> [B*NH, S, Dh] bf16.
    NOTE: reference calls bert(x) with only input_ids, so attention_mask is
    all-ones and no additive padding mask is needed.
    # TODO(synk): for S >= ~1024 switch to a flash-style online-softmax kernel.
    """
    BN, S, Dh = q.shape
    scale = 1.0 / (Dh ** 0.5)
    spec = pl.BlockSpec((1, S, Dh), lambda i: (i, 0, 0))
    return pl.pallas_call(
        functools.partial(_attn_kernel, scale=scale),
        out_shape=jax.ShapeDtypeStruct((BN, S, Dh), q.dtype),
        grid=(BN,),
        in_specs=[spec, spec, spec],
        out_specs=pl.BlockSpec((1, S, Dh), lambda i: (i, 0, 0)),
        compiler_params=pltpu.CompilerParams(dimension_semantics=("parallel",)),
    )(q, k, v)


# ------------------------------ Conv1d ('same') ----------------------------- #

def _conv1d_kernel(x_ref, w_ref, o_ref, *, K, S):
    # x_ref block: (1, S + K - 1, H), already zero-padded in the wrapper.
    xp = x_ref[0]                                            # (S+K-1, H) bf16
    # out[s] = sum_k x_pad[s + k] @ W[k]; build a tap-major slab (S, K*H) and
    # do a single long-K MXU matmul against the tap-major weight (K*H, H_out).
    taps = [xp[k:k + S, :] for k in range(K)]                # static slices
    slab = jnp.concatenate(taps, axis=-1).astype(w_ref.dtype)
    o_ref[0] = jnp.dot(slab, w_ref[...],
                       preferred_element_type=jnp.float32).astype(o_ref.dtype)


def conv1d_same(x, w_kio, out_dtype=jnp.float32):
    """x: [B, S, H] bf16, w_kio: [K, H_in, H_out] bf16.  'Same'-padded Conv1d
    over the S axis, no bias.  Equivalent to torch: Conv1d(H, H, K, bias=False,
    padding=(K-1)//2) applied to x.transpose(1,2), transposed back."""
    B, S, H = x.shape
    K, _, H_out = w_kio.shape
    assert K % 2 == 1, "only odd kernel_size keeps the sequence length"
    pad = (K - 1) // 2
    # Zero-pad once in the wrapper (cheap HBM copy, unambiguous semantics).
    x_pad = jnp.pad(x, ((0, 0), (pad, pad), (0, 0)))
    Sp = S + 2 * pad
    w2d = w_kio.reshape(K * H, H_out)      # rows tap-major, matches the in-kernel slab
    return pl.pallas_call(
        functools.partial(_conv1d_kernel, K=K, S=S),
        out_shape=jax.ShapeDtypeStruct((B, S, H_out), out_dtype),
        grid=(B,),
        in_specs=[
            pl.BlockSpec((1, Sp, H), lambda b: (b, 0, 0)),
            pl.BlockSpec((K * H, H_out), lambda b: (0, 0)),
        ],
        out_specs=pl.BlockSpec((1, S, H_out), lambda b: (b, 0, 0)),
        compiler_params=pltpu.CompilerParams(dimension_semantics=("parallel",)),
    )(x_pad, w2d)


# -------------------------- parameter construction ------------------------- #

def init_params(key, *, vocab_size, hidden, n_layers, n_heads, intermediate,
                max_pos, type_vocab, kernel_size):
    # TODO(synk): BertModel.from_pretrained loads checkpoint weights; random init here.
    def nrm(k, shape, scale=0.02, dtype=jnp.float32):
        return (scale * jax.random.normal(k, shape)).astype(dtype)

    keys = iter(jax.random.split(key, 8 + 4 * n_layers))
    p = {
        "word_emb": nrm(next(keys), (vocab_size, hidden)),
        "pos_emb": nrm(next(keys), (max_pos, hidden)),
        "type_emb": nrm(next(keys), (type_vocab, hidden)),
        "emb_ln_g": jnp.ones((hidden,), jnp.float32),
        "emb_ln_b": jnp.zeros((hidden,), jnp.float32),
        # Conv1d weight as [K, H_in, H_out] (== torch W[:, :, k].T), bf16 for the MXU.
        "conv_w": nrm(next(keys), (kernel_size, hidden, hidden), scale=0.05,
                      dtype=jnp.bfloat16),
        "layers": [],
    }
    for _ in range(n_layers):
        layer = {
            # fused Q|K|V projection: one [H, 3H] matmul.
            "wqkv": nrm(next(keys), (hidden, 3 * hidden), dtype=jnp.bfloat16),
            "bqkv": jnp.zeros((3 * hidden,), jnp.float32),
            "wo": nrm(next(keys), (hidden, hidden), dtype=jnp.bfloat16),
            "bo": jnp.zeros((hidden,), jnp.float32),
            "ln1_g": jnp.ones((hidden,), jnp.float32),
            "ln1_b": jnp.zeros((hidden,), jnp.float32),
            "wi": nrm(next(keys), (hidden, intermediate), dtype=jnp.bfloat16),
            "bi": jnp.zeros((intermediate,), jnp.float32),
            "wo2": nrm(next(keys), (intermediate, hidden), dtype=jnp.bfloat16),
            "bo2": jnp.zeros((hidden,), jnp.float32),
            "ln2_g": jnp.ones((hidden,), jnp.float32),
            "ln2_b": jnp.zeros((hidden,), jnp.float32),
        }
        p["layers"].append(layer)
    return p


# ------------------------------- forward pass ------------------------------ #

def bert_layer(x2d, lyr, B, S, n_heads):
    H = lyr["wo"].shape[0]
    Dh = H // n_heads

    qkv = dense(x2d, lyr["wqkv"], lyr["bqkv"])          # [B*S, 3H] bf16, fused QKV
    q, k, v = qkv[:, :H], qkv[:, H:2 * H], qkv[:, 2 * H:]

    def split_heads(t):                                  # [B*S, H] -> [B*NH, S, Dh]
        return (t.reshape(B, S, n_heads, Dh)
                 .transpose(0, 2, 1, 3)
                 .reshape(B * n_heads, S, Dh))

    ctx = attention(split_heads(q), split_heads(k), split_heads(v))
    ctx = (ctx.reshape(B, n_heads, S, Dh)
              .transpose(0, 2, 1, 3)
              .reshape(B * S, H))

    attn_out = dense(ctx, lyr["wo"], lyr["bo"])
    x2d = add_layernorm(attn_out, x2d, lyr["ln1_g"], lyr["ln1_b"])   # fused residual+LN

    h = dense(x2d, lyr["wi"], lyr["bi"], activation="gelu")
    h = dense(h, lyr["wo2"], lyr["bo2"])
    x2d = add_layernorm(h, x2d, lyr["ln2_g"], lyr["ln2_b"])
    return x2d


def bert_cnn_forward(params, input_ids, *, n_heads):
    """BertCNN.forward: x = bert(input_ids)[0]; x = cnn(x)  -> [B, S, H]."""
    B, S = input_ids.shape
    H = params["word_emb"].shape[1]

    # Embedding gather + position/type embeddings: plain-JAX glue (data-dependent
    # gather; no clean static BlockSpec equivalent at these shapes).
    emb = (params["word_emb"][input_ids]
           + params["pos_emb"][:S][None, :, :]
           + params["type_emb"][0][None, None, :])
    x2d = layernorm(emb.reshape(B * S, H), params["emb_ln_g"], params["emb_ln_b"])

    for lyr in params["layers"]:
        x2d = bert_layer(x2d, lyr, B, S, n_heads)

    seq_out = x2d.reshape(B, S, H)          # == bert(x)[0], last hidden state
    return conv1d_same(seq_out, params["conv_w"])


# ----------------------------------- main ----------------------------------- #

if __name__ == "__main__":
    B, S = 2, 8
    HIDDEN, N_HEADS, INTERMEDIATE = 32, 4, 64
    N_LAYERS, VOCAB, MAX_POS, TYPE_VOCAB = 2, 30, 16, 2
    KERNEL_SIZE = 3

    key = jax.random.PRNGKey(0)
    k_params, k_ids = jax.random.split(key)
    params = init_params(
        k_params, vocab_size=VOCAB, hidden=HIDDEN, n_layers=N_LAYERS,
        n_heads=N_HEADS, intermediate=INTERMEDIATE, max_pos=MAX_POS,
        type_vocab=TYPE_VOCAB, kernel_size=KERNEL_SIZE)

    input_ids = jax.random.randint(k_ids, (B, S), 0, VOCAB, dtype=jnp.int32)

    fwd = jax.jit(bert_cnn_forward, static_argnames=("n_heads",))
    out = fwd(params, input_ids, n_heads=N_HEADS)
    out = jax.block_until_ready(out)
    assert out.shape == (B, S, HIDDEN), out.shape
    assert out.dtype == jnp.float32, out.dtype
    print("KERNEL_OK")
</pallas_src>

<mosaic_0001>
module attributes {stable_mosaic.version = 11 : i64} {
  func.func @_matmul_kernel(%arg0: i32, %arg1: i32, %arg2: i32, %arg3: memref<16x32xbf16, #tpu.memory_space<vmem>>, %arg4: memref<32x96xbf16, #tpu.memory_space<vmem>>, %arg5: memref<1x96xf32, #tpu.memory_space<vmem>>, %arg6: memref<16x96xbf16, #tpu.memory_space<vmem>>, %arg7: memref<16x96xf32, #tpu.memory_space<vmem>>) attributes {dimension_semantics = [#tpu.dimension_semantics<parallel>, #tpu.dimension_semantics<parallel>, #tpu.dimension_semantics<arbitrary>], iteration_bounds = array<i64: 1, 1, 1>, scalar_prefetch = 0 : i64, scratch_operands = 1 : i64, tpu.core_type = #tpu.core_type<tc>, window_params = [{transform_indices = @transform_0, window_bounds = array<i64: 16, 32>}, {transform_indices = @transform_1, window_bounds = array<i64: 32, 96>}, {transform_indices = @transform_2, window_bounds = array<i64: 1, 96>}, {transform_indices = @transform_3, window_bounds = array<i64: 16, 96>}]} {
    %c0_i32 = arith.constant 0 : i32
    %0 = arith.cmpi eq, %arg2, %c0_i32 : i32
    %1 = arith.extui %0 : i1 to i32
    %c0_i32_0 = arith.constant 0 : i32
    %2 = arith.cmpi ne, %1, %c0_i32_0 : i32
    scf.if %2 {
      %cst_10 = arith.constant 0.000000e+00 : f32
      %12 = vector.broadcast %cst_10 : f32 to vector<16x96xf32>
      %c0_11 = arith.constant 0 : index
      %c0_12 = arith.constant 0 : index
      %13 = vector.load %arg7[%c0_11, %c0_12] : memref<16x96xf32, #tpu.memory_space<vmem>>, vector<16x96xf32>
      tpu.vector_store %arg7[%c0_11, %c0_12], %12 {strides = array<i32>} : memref<16x96xf32, #tpu.memory_space<vmem>>, vector<16x96xf32>,
    } else {
    }
    %c0 = arith.constant 0 : index
    %c0_1 = arith.constant 0 : index
    %3 = vector.load %arg7[%c0, %c0_1] : memref<16x96xf32, #tpu.memory_space<vmem>>, vector<16x96xf32>
    %c0_2 = arith.constant 0 : index
    %c0_3 = arith.constant 0 : index
    %4 = vector.load %arg3[%c0_2, %c0_3] : memref<16x32xbf16, #tpu.memory_space<vmem>>, vector<16x32xbf16>
    %c0_4 = arith.constant 0 : index
    %c0_5 = arith.constant 0 : index
    %5 = vector.load %arg4[%c0_4, %c0_5] : memref<32x96xbf16, #tpu.memory_space<vmem>>, vector<32x96xbf16>
    %cst = arith.constant dense<0.000000e+00> : vector<16x96xf32>
    %6 = tpu.matmul %4, %5, %cst {dimension_numbers = #tpu.dot_dimension_numbers<[1], [0], [0], [1], [0, 0, 1, 1], [], []>} : vector<16x32xbf16>, vector<32x96xbf16>, vector<16x96xf32> -> vector<16x96xf32>
    %7 = arith.addf %3, %6 : vector<16x96xf32>
    %c0_6 = arith.constant 0 : index
    %c0_7 = arith.constant 0 : index
    %8 = vector.load %arg7[%c0_6, %c0_7] : memref<16x96xf32, #tpu.memory_space<vmem>>, vector<16x96xf32>
    tpu.vector_store %arg7[%c0_6, %c0_7], %7 {strides = array<i32>} : memref<16x96xf32, #tpu.memory_space<vmem>>, vector<16x96xf32>,
    %c0_i32_8 = arith.constant 0 : i32
    %9 = arith.cmpi eq, %arg2, %c0_i32_8 : i32
    %10 = arith.extui %9 : i1 to i32
    %c0_i32_9 = arith.constant 0 : i32
    %11 = arith.cmpi ne, %10, %c0_i32_9 : i32
    scf.if %11 {
      %c0_10 = arith.constant 0 : index
      %c0_11 = arith.constant 0 : index
      %12 = vector.load %arg7[%c0_10, %c0_11] : memref<16x96xf32, #tpu.memory_space<vmem>>, vector<16x96xf32>
      %c0_12 = arith.constant 0 : index
      %c0_13 = arith.constant 0 : index
      %13 = vector.load %arg5[%c0_12, %c0_13] : memref<1x96xf32, #tpu.memory_space<vmem>>, vector<1x96xf32>
      %14 = vector.broadcast %13 : vector<1x96xf32> to vector<16x96xf32>
      %15 = arith.addf %12, %14 : vector<16x96xf32>
      %16 = arith.truncf %15 : vector<16x96xf32> to vector<16x96xbf16>
      %c0_14 = arith.constant 0 : index
      %c0_15 = arith.constant 0 : index
      %17 = vector.load %arg6[%c0_14, %c0_15] : memref<16x96xbf16, #tpu.memory_space<vmem>>, vector<16x96xbf16>
      tpu.vector_store %arg6[%c0_14, %c0_15], %16 {strides = array<i32>} : memref<16x96xbf16, #tpu.memory_space<vmem>>, vector<16x96xbf16>,
    } else {
    }
    return
  }
  func.func @transform_0(%arg0: i32, %arg1: i32, %arg2: i32) -> (i32, i32) {
    %c0_i32 = arith.constant 0 : i32
    return %arg0, %arg2 : i32, i32
  }
  func.func @transform_1(%arg0: i32, %arg1: i32, %arg2: i32) -> (i32, i32) {
    %c0_i32 = arith.constant 0 : i32
    return %arg2, %arg1 : i32, i32
  }
  func.func @transform_2(%arg0: i32, %arg1: i32, %arg2: i32) -> (i32, i32) {
    %c0_i32 = arith.constant 0 : i32
    %c0_i32_0 = arith.constant 0 : i32
    return %c0_i32, %arg1 : i32, i32
  }
  func.func @transform_3(%arg0: i32, %arg1: i32, %arg2: i32) -> (i32, i32) {
    %c0_i32 = arith.constant 0 : i32
    return %arg0, %arg1 : i32, i32
  }
}

module attributes {stable_mosaic.version = 11 : i64} {
  func.func @_attn_kernel(%arg0: i32, %arg1: memref<1x8x8xbf16, #tpu.memory_space<vmem>>, %arg2: memref<1x8x8xbf16, #tpu.memory_space<vmem>>, %arg3: memref<1x8x8xbf16, #tpu.memory_space<vmem>>, %arg4: memref<1x8x8xbf16, #tpu.memory_space<vmem>>) attributes {dimension_semantics = [#tpu.dimension_semantics<parallel>], iteration_bounds = array<i64: 8>, scalar_prefetch = 0 : i64, scratch_operands = 0 : i64, tpu.core_type = #tpu.core_type<tc>, window_params = [{transform_indices = @transform_0, window_bounds = array<i64: 1, 8, 8>}, {transform_indices = @transform_1, window_bounds = array<i64: 1, 8, 8>}, {transform_indices = @transform_2, window_bounds = array<i64: 1, 8, 8>}, {transform_indices = @transform_3, window_bounds = array<i64: 1, 8, 8>}]} {
    %c0 = arith.constant 0 : index
    %c0_0 = arith.constant 0 : index
    %c0_1 = arith.constant 0 : index
    %0 = vector.load %arg2[%c0, %c0_0, %c0_1] : memref<1x8x8xbf16, #tpu.memory_space<vmem>>, vector<1x8x8xbf16>
    %1 = vector.shape_cast %0 : vector<1x8x8xbf16> to vector<8x8xbf16>
    %c0_2 = arith.constant 0 : index
    %c0_3 = arith.constant 0 : index
    %c0_4 = arith.constant 0 : index
    %2 = vector.load %arg3[%c0_2, %c0_3, %c0_4] : memref<1x8x8xbf16, #tpu.memory_space<vmem>>, vector<1x8x8xbf16>
    %3 = vector.shape_cast %2 : vector<1x8x8xbf16> to vector<8x8xbf16>
    %c0_5 = arith.constant 0 : index
    %c0_6 = arith.constant 0 : index
    %c0_7 = arith.constant 0 : index
    %4 = vector.load %arg1[%c0_5, %c0_6, %c0_7] : memref<1x8x8xbf16, #tpu.memory_space<vmem>>, vector<1x8x8xbf16>
    %5 = vector.shape_cast %4 : vector<1x8x8xbf16> to vector<8x8xbf16>
    %6 = arith.extf %5 : vector<8x8xbf16> to vector<8x8xf32>
    %cst = arith.constant 0.353553385 : f32
    %7 = vector.broadcast %cst : f32 to vector<8x8xf32>
    %8 = arith.mulf %6, %7 : vector<8x8xf32>
    %9 = arith.truncf %8 : vector<8x8xf32> to vector<8x8xbf16>
    %cst_8 = arith.constant dense<0.000000e+00> : vector<8x8xf32>
    %10 = tpu.matmul %9, %1, %cst_8 {dimension_numbers = #tpu.dot_dimension_numbers<[1], [1], [0], [0], [0, 0, 1, 0], [], []>} : vector<8x8xbf16>, vector<8x8xbf16>, vector<8x8xf32> -> vector<8x8xf32>
    %cst_9 = arith.constant dense<0xFF800000> : vector<8xf32>
    %11 = vector.multi_reduction <maximumf>, %10, %cst_9 [1] : vector<8x8xf32> to vector<8xf32>
    %12 = vector.shape_cast %11 : vector<8xf32> to vector<8x1xf32>
    %13 = vector.broadcast %12 : vector<8x1xf32> to vector<8x8xf32>
    %14 = arith.subf %10, %13 : vector<8x8xf32>
    %15 = math.exp %14 : vector<8x8xf32>
    %cst_10 = arith.constant dense<0.000000e+00> : vector<8xf32>
    %16 = vector.multi_reduction <add>, %15, %cst_10 [1] : vector<8x8xf32> to vector<8xf32>
    %17 = vector.shape_cast %16 : vector<8xf32> to vector<8x1xf32>
    %18 = tpu.reciprocal %17 {approx = true} : vector<8x1xf32> -> vector<8x1xf32>
    %19 = arith.truncf %15 : vector<8x8xf32> to vector<8x8xbf16>
    %cst_11 = arith.constant dense<0.000000e+00> : vector<8x8xf32>
    %20 = tpu.matmul %19, %3, %cst_11 {dimension_numbers = #tpu.dot_dimension_numbers<[1], [0], [0], [1], [0, 0, 1, 1], [], []>} : vector<8x8xbf16>, vector<8x8xbf16>, vector<8x8xf32> -> vector<8x8xf32>
    %21 = vector.broadcast %18 : vector<8x1xf32> to vector<8x8xf32>
    %22 = arith.mulf %20, %21 : vector<8x8xf32>
    %23 = arith.truncf %22 : vector<8x8xf32> to vector<8x8xbf16>
    %c0_12 = arith.constant 0 : index
    %c0_13 = arith.constant 0 : index
    %c0_14 = arith.constant 0 : index
    %24 = vector.load %arg4[%c0_12, %c0_13, %c0_14] : memref<1x8x8xbf16, #tpu.memory_space<vmem>>, vector<1x8x8xbf16>
    %25 = vector.shape_cast %24 : vector<1x8x8xbf16> to vector<8x8xbf16>
    %26 = vector.shape_cast %23 : vector<8x8xbf16> to vector<1x8x8xbf16>
    tpu.vector_store %arg4[%c0_12, %c0_13, %c0_14], %26 {strides = array<i32>} : memref<1x8x8xbf16, #tpu.memory_space<vmem>>, vector<1x8x8xbf16>,
    return
  }
  func.func @transform_0(%arg0: i32) -> (i32, i32, i32) {
    %c0_i32 = arith.constant 0 : i32
    %c0_i32_0 = arith.constant 0 : i32
    %c0_i32_1 = arith.constant 0 : i32
    return %arg0, %c0_i32, %c0_i32_0 : i32, i32, i32
  }
  func.func @transform_1(%arg0: i32) -> (i32, i32, i32) {
    %c0_i32 = arith.constant 0 : i32
    %c0_i32_0 = arith.constant 0 : i32
    %c0_i32_1 = arith.constant 0 : i32
    return %arg0, %c0_i32, %c0_i32_0 : i32, i32, i32
  }
  func.func @transform_2(%arg0: i32) -> (i32, i32, i32) {
    %c0_i32 = arith.constant 0 : i32
    %c0_i32_0 = arith.constant 0 : i32
    %c0_i32_1 = arith.constant 0 : i32
    return %arg0, %c0_i32, %c0_i32_0 : i32, i32, i32
  }
  func.func @transform_3(%arg0: i32) -> (i32, i32, i32) {
    %c0_i32 = arith.constant 0 : i32
    %c0_i32_0 = arith.constant 0 : i32
    %c0_i32_1 = arith.constant 0 : i32
    return %arg0, %c0_i32, %c0_i32_0 : i32, i32, i32
  }
}

module attributes {stable_mosaic.version = 11 : i64} {
  func.func @_ln_kernel(%arg0: i32, %arg1: memref<16x32xf32, #tpu.memory_space<vmem>>, %arg2: memref<1x32xf32, #tpu.memory_space<vmem>>, %arg3: memref<1x32xf32, #tpu.memory_space<vmem>>, %arg4: memref<16x32xbf16, #tpu.memory_space<vmem>>) attributes {dimension_semantics = [#tpu.dimension_semantics<parallel>], iteration_bounds = array<i64: 1>, scalar_prefetch = 0 : i64, scratch_operands = 0 : i64, tpu.core_type = #tpu.core_type<tc>, window_params = [{transform_indices = @transform_0, window_bounds = array<i64: 16, 32>}, {pipeline_mode = #tpu.pipeline_mode<synchronous>, transform_indices = @transform_1, window_bounds = array<i64: 1, 32>}, {pipeline_mode = #tpu.pipeline_mode<synchronous>, transform_indices = @transform_2, window_bounds = array<i64: 1, 32>}, {transform_indices = @transform_3, window_bounds = array<i64: 16, 32>}]} {
    %c0 = arith.constant 0 : index
    %c0_0 = arith.constant 0 : index
    %0 = vector.load %arg1[%c0, %c0_0] : memref<16x32xf32, #tpu.memory_space<vmem>>, vector<16x32xf32>
    %c0_1 = arith.constant 0 : index
    %c0_2 = arith.constant 0 : index
    %1 = vector.load %arg2[%c0_1, %c0_2] : memref<1x32xf32, #tpu.memory_space<vmem>>, vector<1x32xf32>
    %c0_3 = arith.constant 0 : index
    %c0_4 = arith.constant 0 : index
    %2 = vector.load %arg3[%c0_3, %c0_4] : memref<1x32xf32, #tpu.memory_space<vmem>>, vector<1x32xf32>
    %cst = arith.constant dense<0.000000e+00> : vector<16xf32>
    %3 = vector.multi_reduction <add>, %0, %cst [1] : vector<16x32xf32> to vector<16xf32>
    %4 = vector.shape_cast %3 : vector<16xf32> to vector<16x1xf32>
    %cst_5 = arith.constant 3.200000e+01 : f32
    %5 = vector.broadcast %cst_5 : f32 to vector<16x1xf32>
    %6 = arith.divf %4, %5 : vector<16x1xf32>
    %7 = vector.broadcast %6 : vector<16x1xf32> to vector<16x32xf32>
    %8 = arith.subf %0, %7 : vector<16x32xf32>
    %9 = arith.mulf %8, %8 : vector<16x32xf32>
    %cst_6 = arith.constant dense<0.000000e+00> : vector<16xf32>
    %10 = vector.multi_reduction <add>, %9, %cst_6 [1] : vector<16x32xf32> to vector<16xf32>
    %11 = vector.shape_cast %10 : vector<16xf32> to vector<16x1xf32>
    %cst_7 = arith.constant 3.200000e+01 : f32
    %12 = vector.broadcast %cst_7 : f32 to vector<16x1xf32>
    %13 = arith.divf %11, %12 : vector<16x1xf32>
    %cst_8 = arith.constant 9.99999996E-13 : f32
    %14 = vector.broadcast %cst_8 : f32 to vector<16x1xf32>
    %15 = arith.addf %13, %14 : vector<16x1xf32>
    %16 = math.rsqrt %15 : vector<16x1xf32>
    %17 = vector.broadcast %6 : vector<16x1xf32> to vector<16x32xf32>
    %18 = arith.subf %0, %17 : vector<16x32xf32>
    %19 = vector.broadcast %16 : vector<16x1xf32> to vector<16x32xf32>
    %20 = arith.mulf %18, %19 : vector<16x32xf32>
    %21 = vector.broadcast %1 : vector<1x32xf32> to vector<16x32xf32>
    %22 = arith.mulf %20, %21 : vector<16x32xf32>
    %23 = vector.broadcast %2 : vector<1x32xf32> to vector<16x32xf32>
    %24 = arith.addf %22, %23 : vector<16x32xf32>
    %25 = arith.truncf %24 : vector<16x32xf32> to vector<16x32xbf16>
    %c0_9 = arith.constant 0 : index
    %c0_10 = arith.constant 0 : index
    %26 = vector.load %arg4[%c0_9, %c0_10] : memref<16x32xbf16, #tpu.memory_space<vmem>>, vector<16x32xbf16>
    tpu.vector_store %arg4[%c0_9, %c0_10], %25 {strides = array<i32>} : memref<16x32xbf16, #tpu.memory_space<vmem>>, vector<16x32xbf16>,
    return
  }
  func.func @transform_0(%arg0: i32) -> (i32, i32) {
    %c0_i32 = arith.constant 0 : i32
    %c0_i32_0 = arith.constant 0 : i32
    return %arg0, %c0_i32 : i32, i32
  }
  func.func @transform_1(%arg0: i32) -> (i32, i32) {
    %c0_i32 = arith.constant 0 : i32
    %c0_i32_0 = arith.constant 0 : i32
    %c0_i32_1 = arith.constant 0 : i32
    return %c0_i32, %c0_i32_0 : i32, i32
  }
  func.func @transform_2(%arg0: i32) -> (i32, i32) {
    %c0_i32 = arith.constant 0 : i32
    %c0_i32_0 = arith.constant 0 : i32
    %c0_i32_1 = arith.constant 0 : i32
    return %c0_i32, %c0_i32_0 : i32, i32
  }
  func.func @transform_3(%arg0: i32) -> (i32, i32) {
    %c0_i32 = arith.constant 0 : i32
    %c0_i32_0 = arith.constant 0 : i32
    return %arg0, %c0_i32 : i32, i32
  }
}

module attributes {stable_mosaic.version = 11 : i64} {
  func.func @_matmul_kernel(%arg0: i32, %arg1: i32, %arg2: i32, %arg3: memref<16x32xbf16, #tpu.memory_space<vmem>>, %arg4: memref<32x32xbf16, #tpu.memory_space<vmem>>, %arg5: memref<1x32xf32, #tpu.memory_space<vmem>>, %arg6: memref<16x32xbf16, #tpu.memory_space<vmem>>, %arg7: memref<16x32xf32, #tpu.memory_space<vmem>>) attributes {dimension_semantics = [#tpu.dimension_semantics<parallel>, #tpu.dimension_semantics<parallel>, #tpu.dimension_semantics<arbitrary>], iteration_bounds = array<i64: 1, 1, 1>, scalar_prefetch = 0 : i64, scratch_operands = 1 : i64, tpu.core_type = #tpu.core_type<tc>, window_params = [{transform_indices = @transform_0, window_bounds = array<i64: 16, 32>}, {transform_indices = @transform_1, window_bounds = array<i64: 32, 32>}, {transform_indices = @transform_2, window_bounds = array<i64: 1, 32>}, {transform_indices = @transform_3, window_bounds = array<i64: 16, 32>}]} {
    %c0_i32 = arith.constant 0 : i32
    %0 = arith.cmpi eq, %arg2, %c0_i32 : i32
    %1 = arith.extui %0 : i1 to i32
    %c0_i32_0 = arith.constant 0 : i32
    %2 = arith.cmpi ne, %1, %c0_i32_0 : i32
    scf.if %2 {
      %cst_10 = arith.constant 0.000000e+00 : f32
      %12 = vector.broadcast %cst_10 : f32 to vector<16x32xf32>
      %c0_11 = arith.constant 0 : index
      %c0_12 = arith.constant 0 : index
      %13 = vector.load %arg7[%c0_11, %c0_12] : memref<16x32xf32, #tpu.memory_space<vmem>>, vector<16x32xf32>
      tpu.vector_store %arg7[%c0_11, %c0_12], %12 {strides = array<i32>} : memref<16x32xf32, #tpu.memory_space<vmem>>, vector<16x32xf32>,
    } else {
    }
    %c0 = arith.constant 0 : index
    %c0_1 = arith.constant 0 : index
    %3 = vector.load %arg7[%c0, %c0_1] : memref<16x32xf32, #tpu.memory_space<vmem>>, vector<16x32xf32>
    %c0_2 = arith.constant 0 : index
    %c0_3 = arith.constant 0 : index
    %4 = vector.load %arg3[%c0_2, %c0_3] : memref<16x32xbf16, #tpu.memory_space<vmem>>, vector<16x32xbf16>
    %c0_4 = arith.constant 0 : index
    %c0_5 = arith.constant 0 : index
    %5 = vector.load %arg4[%c0_4, %c0_5] : memref<32x32xbf16, #tpu.memory_space<vmem>>, vector<32x32xbf16>
    %cst = arith.constant dense<0.000000e+00> : vector<16x32xf32>
    %6 = tpu.matmul %4, %5, %cst {dimension_numbers = #tpu.dot_dimension_numbers<[1], [0], [0], [1], [0, 0, 1, 1], [], []>} : vector<16x32xbf16>, vector<32x32xbf16>, vector<16x32xf32> -> vector<16x32xf32>
    %7 = arith.addf %3, %6 : vector<16x32xf32>
    %c0_6 = arith.constant 0 : index
    %c0_7 = arith.constant 0 : index
    %8 = vector.load %arg7[%c0_6, %c0_7] : memref<16x32xf32, #tpu.memory_space<vmem>>, vector<16x32xf32>
    tpu.vector_store %arg7[%c0_6, %c0_7], %7 {strides = array<i32>} : memref<16x32xf32, #tpu.memory_space<vmem>>, vector<16x32xf32>,
    %c0_i32_8 = arith.constant 0 : i32
    %9 = arith.cmpi eq, %arg2, %c0_i32_8 : i32
    %10 = arith.extui %9 : i1 to i32
    %c0_i32_9 = arith.constant 0 : i32
    %11 = arith.cmpi ne, %10, %c0_i32_9 : i32
    scf.if %11 {
      %c0_10 = arith.constant 0 : index
      %c0_11 = arith.constant 0 : index
      %12 = vector.load %arg7[%c0_10, %c0_11] : memref<16x32xf32, #tpu.memory_space<vmem>>, vector<16x32xf32>
      %c0_12 = arith.constant 0 : index
      %c0_13 = arith.constant 0 : index
      %13 = vector.load %arg5[%c0_12, %c0_13] : memref<1x32xf32, #tpu.memory_space<vmem>>, vector<1x32xf32>
      %14 = vector.broadcast %13 : vector<1x32xf32> to vector<16x32xf32>
      %15 = arith.addf %12, %14 : vector<16x32xf32>
      %16 = arith.truncf %15 : vector<16x32xf32> to vector<16x32xbf16>
      %c0_14 = arith.constant 0 : index
      %c0_15 = arith.constant 0 : index
      %17 = vector.load %arg6[%c0_14, %c0_15] : memref<16x32xbf16, #tpu.memory_space<vmem>>, vector<16x32xbf16>
      tpu.vector_store %arg6[%c0_14, %c0_15], %16 {strides = array<i32>} : memref<16x32xbf16, #tpu.memory_space<vmem>>, vector<16x32xbf16>,
    } else {
    }
    return
  }
  func.func @transform_0(%arg0: i32, %arg1: i32, %arg2: i32) -> (i32, i32) {
    %c0_i32 = arith.constant 0 : i32
    return %arg0, %arg2 : i32, i32
  }
  func.func @transform_1(%arg0: i32, %arg1: i32, %arg2: i32) -> (i32, i32) {
    %c0_i32 = arith.constant 0 : i32
    return %arg2, %arg1 : i32, i32
  }
  func.func @transform_2(%arg0: i32, %arg1: i32, %arg2: i32) -> (i32, i32) {
    %c0_i32 = arith.constant 0 : i32
    %c0_i32_0 = arith.constant 0 : i32
    return %c0_i32, %arg1 : i32, i32
  }
  func.func @transform_3(%arg0: i32, %arg1: i32, %arg2: i32) -> (i32, i32) {
    %c0_i32 = arith.constant 0 : i32
    return %arg0, %arg1 : i32, i32
  }
}

module attributes {stable_mosaic.version = 11 : i64} {
  func.func @_add_ln_kernel(%arg0: i32, %arg1: memref<16x32xbf16, #tpu.memory_space<vmem>>, %arg2: memref<16x32xbf16, #tpu.memory_space<vmem>>, %arg3: memref<1x32xf32, #tpu.memory_space<vmem>>, %arg4: memref<1x32xf32, #tpu.memory_space<vmem>>, %arg5: memref<16x32xbf16, #tpu.memory_space<vmem>>) attributes {dimension_semantics = [#tpu.dimension_semantics<parallel>], iteration_bounds = array<i64: 1>, scalar_prefetch = 0 : i64, scratch_operands = 0 : i64, tpu.core_type = #tpu.core_type<tc>, window_params = [{transform_indices = @transform_0, window_bounds = array<i64: 16, 32>}, {transform_indices = @transform_1, window_bounds = array<i64: 16, 32>}, {pipeline_mode = #tpu.pipeline_mode<synchronous>, transform_indices = @transform_2, window_bounds = array<i64: 1, 32>}, {pipeline_mode = #tpu.pipeline_mode<synchronous>, transform_indices = @transform_3, window_bounds = array<i64: 1, 32>}, {transform_indices = @transform_4, window_bounds = array<i64: 16, 32>}]} {
    %c0 = arith.constant 0 : index
    %c0_0 = arith.constant 0 : index
    %0 = vector.load %arg1[%c0, %c0_0] : memref<16x32xbf16, #tpu.memory_space<vmem>>, vector<16x32xbf16>
    %1 = arith.extf %0 : vector<16x32xbf16> to vector<16x32xf32>
    %c0_1 = arith.constant 0 : index
    %c0_2 = arith.constant 0 : index
    %2 = vector.load %arg2[%c0_1, %c0_2] : memref<16x32xbf16, #tpu.memory_space<vmem>>, vector<16x32xbf16>
    %3 = arith.extf %2 : vector<16x32xbf16> to vector<16x32xf32>
    %4 = arith.addf %1, %3 : vector<16x32xf32>
    %c0_3 = arith.constant 0 : index
    %c0_4 = arith.constant 0 : index
    %5 = vector.load %arg3[%c0_3, %c0_4] : memref<1x32xf32, #tpu.memory_space<vmem>>, vector<1x32xf32>
    %c0_5 = arith.constant 0 : index
    %c0_6 = arith.constant 0 : index
    %6 = vector.load %arg4[%c0_5, %c0_6] : memref<1x32xf32, #tpu.memory_space<vmem>>, vector<1x32xf32>
    %cst = arith.constant dense<0.000000e+00> : vector<16xf32>
    %7 = vector.multi_reduction <add>, %4, %cst [1] : vector<16x32xf32> to vector<16xf32>
    %8 = vector.shape_cast %7 : vector<16xf32> to vector<16x1xf32>
    %cst_7 = arith.constant 3.200000e+01 : f32
    %9 = vector.broadcast %cst_7 : f32 to vector<16x1xf32>
    %10 = arith.divf %8, %9 : vector<16x1xf32>
    %11 = vector.broadcast %10 : vector<16x1xf32> to vector<16x32xf32>
    %12 = arith.subf %4, %11 : vector<16x32xf32>
    %13 = arith.mulf %12, %12 : vector<16x32xf32>
    %cst_8 = arith.constant dense<0.000000e+00> : vector<16xf32>
    %14 = vector.multi_reduction <add>, %13, %cst_8 [1] : vector<16x32xf32> to vector<16xf32>
    %15 = vector.shape_cast %14 : vector<16xf32> to vector<16x1xf32>
    %cst_9 = arith.constant 3.200000e+01 : f32
    %16 = vector.broadcast %cst_9 : f32 to vector<16x1xf32>
    %17 = arith.divf %15, %16 : vector<16x1xf32>
    %cst_10 = arith.constant 9.99999996E-13 : f32
    %18 = vector.broadcast %cst_10 : f32 to vector<16x1xf32>
    %19 = arith.addf %17, %18 : vector<16x1xf32>
    %20 = math.rsqrt %19 : vector<16x1xf32>
    %21 = vector.broadcast %10 : vector<16x1xf32> to vector<16x32xf32>
    %22 = arith.subf %4, %21 : vector<16x32xf32>
    %23 = vector.broadcast %20 : vector<16x1xf32> to vector<16x32xf32>
    %24 = arith.mulf %22, %23 : vector<16x32xf32>
    %25 = vector.broadcast %5 : vector<1x32xf32> to vector<16x32xf32>
    %26 = arith.mulf %24, %25 : vector<16x32xf32>
    %27 = vector.broadcast %6 : vector<1x32xf32> to vector<16x32xf32>
    %28 = arith.addf %26, %27 : vector<16x32xf32>
    %29 = arith.truncf %28 : vector<16x32xf32> to vector<16x32xbf16>
    %c0_11 = arith.constant 0 : index
    %c0_12 = arith.constant 0 : index
    %30 = vector.load %arg5[%c0_11, %c0_12] : memref<16x32xbf16, #tpu.memory_space<vmem>>, vector<16x32xbf16>
    tpu.vector_store %arg5[%c0_11, %c0_12], %29 {strides = array<i32>} : memref<16x32xbf16, #tpu.memory_space<vmem>>, vector<16x32xbf16>,
    return
  }
  func.func @transform_0(%arg0: i32) -> (i32, i32) {
    %c0_i32 = arith.constant 0 : i32
    %c0_i32_0 = arith.constant 0 : i32
    return %arg0, %c0_i32 : i32, i32
  }
  func.func @transform_1(%arg0: i32) -> (i32, i32) {
    %c0_i32 = arith.constant 0 : i32
    %c0_i32_0 = arith.constant 0 : i32
    return %arg0, %c0_i32 : i32, i32
  }
  func.func @transform_2(%arg0: i32) -> (i32, i32) {
    %c0_i32 = arith.constant 0 : i32
    %c0_i32_0 = arith.constant 0 : i32
    %c0_i32_1 = arith.constant 0 : i32
    return %c0_i32, %c0_i32_0 : i32, i32
  }
  func.func @transform_3(%arg0: i32) -> (i32, i32) {
    %c0_i32 = arith.constant 0 : i32
    %c0_i32_0 = arith.constant 0 : i32
    %c0_i32_1 = arith.constant 0 : i32
    return %c0_i32, %c0_i32_0 : i32, i32
  }
  func.func @transform_4(%arg0: i32) -> (i32, i32) {
    %c0_i32 = arith.constant 0 : i32
    %c0_i32_0 = arith.constant 0 : i32
    return %arg0, %c0_i32 : i32, i32
  }
}

module attributes {stable_mosaic.version = 11 : i64} {
  func.func @_matmul_kernel(%arg0: i32, %arg1: i32, %arg2: i32, %arg3: memref<16x32xbf16, #tpu.memory_space<vmem>>, %arg4: memref<32x64xbf16, #tpu.memory_space<vmem>>, %arg5: memref<1x64xf32, #tpu.memory_space<vmem>>, %arg6: memref<16x64xbf16, #tpu.memory_space<vmem>>, %arg7: memref<16x64xf32, #tpu.memory_space<vmem>>) attributes {dimension_semantics = [#tpu.dimension_semantics<parallel>, #tpu.dimension_semantics<parallel>, #tpu.dimension_semantics<arbitrary>], iteration_bounds = array<i64: 1, 1, 1>, scalar_prefetch = 0 : i64, scratch_operands = 1 : i64, tpu.core_type = #tpu.core_type<tc>, window_params = [{transform_indices = @transform_0, window_bounds = array<i64: 16, 32>}, {transform_indices = @transform_1, window_bounds = array<i64: 32, 64>}, {transform_indices = @transform_2, window_bounds = array<i64: 1, 64>}, {transform_indices = @transform_3, window_bounds = array<i64: 16, 64>}]} {
    %c0_i32 = arith.constant 0 : i32
    %0 = arith.cmpi eq, %arg2, %c0_i32 : i32
    %1 = arith.extui %0 : i1 to i32
    %c0_i32_0 = arith.constant 0 : i32
    %2 = arith.cmpi ne, %1, %c0_i32_0 : i32
    scf.if %2 {
      %cst_10 = arith.constant 0.000000e+00 : f32
      %12 = vector.broadcast %cst_10 : f32 to vector<16x64xf32>
      %c0_11 = arith.constant 0 : index
      %c0_12 = arith.constant 0 : index
      %13 = vector.load %arg7[%c0_11, %c0_12] : memref<16x64xf32, #tpu.memory_space<vmem>>, vector<16x64xf32>
      tpu.vector_store %arg7[%c0_11, %c0_12], %12 {strides = array<i32>} : memref<16x64xf32, #tpu.memory_space<vmem>>, vector<16x64xf32>,
    } else {
    }
    %c0 = arith.constant 0 : index
    %c0_1 = arith.constant 0 : index
    %3 = vector.load %arg7[%c0, %c0_1] : memref<16x64xf32, #tpu.memory_space<vmem>>, vector<16x64xf32>
    %c0_2 = arith.constant 0 : index
    %c0_3 = arith.constant 0 : index
    %4 = vector.load %arg3[%c0_2, %c0_3] : memref<16x32xbf16, #tpu.memory_space<vmem>>, vector<16x32xbf16>
    %c0_4 = arith.constant 0 : index
    %c0_5 = arith.constant 0 : index
    %5 = vector.load %arg4[%c0_4, %c0_5] : memref<32x64xbf16, #tpu.memory_space<vmem>>, vector<32x64xbf16>
    %cst = arith.constant dense<0.000000e+00> : vector<16x64xf32>
    %6 = tpu.matmul %4, %5, %cst {dimension_numbers = #tpu.dot_dimension_numbers<[1], [0], [0], [1], [0, 0, 1, 1], [], []>} : vector<16x32xbf16>, vector<32x64xbf16>, vector<16x64xf32> -> vector<16x64xf32>
    %7 = arith.addf %3, %6 : vector<16x64xf32>
    %c0_6 = arith.constant 0 : index
    %c0_7 = arith.constant 0 : index
    %8 = vector.load %arg7[%c0_6, %c0_7] : memref<16x64xf32, #tpu.memory_space<vmem>>, vector<16x64xf32>
    tpu.vector_store %arg7[%c0_6, %c0_7], %7 {strides = array<i32>} : memref<16x64xf32, #tpu.memory_space<vmem>>, vector<16x64xf32>,
    %c0_i32_8 = arith.constant 0 : i32
    %9 = arith.cmpi eq, %arg2, %c0_i32_8 : i32
    %10 = arith.extui %9 : i1 to i32
    %c0_i32_9 = arith.constant 0 : i32
    %11 = arith.cmpi ne, %10, %c0_i32_9 : i32
    scf.if %11 {
      %c0_10 = arith.constant 0 : index
      %c0_11 = arith.constant 0 : index
      %12 = vector.load %arg7[%c0_10, %c0_11] : memref<16x64xf32, #tpu.memory_space<vmem>>, vector<16x64xf32>
      %c0_12 = arith.constant 0 : index
      %c0_13 = arith.constant 0 : index
      %13 = vector.load %arg5[%c0_12, %c0_13] : memref<1x64xf32, #tpu.memory_space<vmem>>, vector<1x64xf32>
      %14 = vector.broadcast %13 : vector<1x64xf32> to vector<16x64xf32>
      %15 = arith.addf %12, %14 : vector<16x64xf32>
      %16 = arith.mulf %15, %15 : vector<16x64xf32>
      %17 = arith.mulf %15, %16 : vector<16x64xf32>
      %cst_14 = arith.constant 4.471500e-02 : f32
      %18 = vector.broadcast %cst_14 : f32 to vector<16x64xf32>
      %19 = arith.mulf %18, %17 : vector<16x64xf32>
      %20 = arith.addf %15, %19 : vector<16x64xf32>
      %cst_15 = arith.constant 0.797884583 : f32
      %21 = vector.broadcast %cst_15 : f32 to vector<16x64xf32>
      %22 = arith.mulf %21, %20 : vector<16x64xf32>
      %23 = math.tanh %22 : vector<16x64xf32>
      %cst_16 = arith.constant 1.000000e+00 : f32
      %24 = vector.broadcast %cst_16 : f32 to vector<16x64xf32>
      %25 = arith.addf %24, %23 : vector<16x64xf32>
      %cst_17 = arith.constant 5.000000e-01 : f32
      %26 = vector.broadcast %cst_17 : f32 to vector<16x64xf32>
      %27 = arith.mulf %26, %25 : vector<16x64xf32>
      %28 = arith.mulf %15, %27 : vector<16x64xf32>
      %29 = arith.truncf %28 : vector<16x64xf32> to vector<16x64xbf16>
      %c0_18 = arith.constant 0 : index
      %c0_19 = arith.constant 0 : index
      %30 = vector.load %arg6[%c0_18, %c0_19] : memref<16x64xbf16, #tpu.memory_space<vmem>>, vector<16x64xbf16>
      tpu.vector_store %arg6[%c0_18, %c0_19], %29 {strides = array<i32>} : memref<16x64xbf16, #tpu.memory_space<vmem>>, vector<16x64xbf16>,
    } else {
    }
    return
  }
  func.func @transform_0(%arg0: i32, %arg1: i32, %arg2: i32) -> (i32, i32) {
    %c0_i32 = arith.constant 0 : i32
    return %arg0, %arg2 : i32, i32
  }
  func.func @transform_1(%arg0: i32, %arg1: i32, %arg2: i32) -> (i32, i32) {
    %c0_i32 = arith.constant 0 : i32
    return %arg2, %arg1 : i32, i32
  }
  func.func @transform_2(%arg0: i32, %arg1: i32, %arg2: i32) -> (i32, i32) {
    %c0_i32 = arith.constant 0 : i32
    %c0_i32_0 = arith.constant 0 : i32
    return %c0_i32, %arg1 : i32, i32
  }
  func.func @transform_3(%arg0: i32, %arg1: i32, %arg2: i32) -> (i32, i32) {
    %c0_i32 = arith.constant 0 : i32
    return %arg0, %arg1 : i32, i32
  }
}

module attributes {stable_mosaic.version = 11 : i64} {
  func.func @_conv1d_kernel(%arg0: i32, %arg1: memref<1x10x32xbf16, #tpu.memory_space<vmem>>, %arg2: memref<96x32xbf16, #tpu.memory_space<vmem>>, %arg3: memref<1x8x32xf32, #tpu.memory_space<vmem>>) attributes {dimension_semantics = [#tpu.dimension_semantics<parallel>], iteration_bounds = array<i64: 2>, scalar_prefetch = 0 : i64, scratch_operands = 0 : i64, tpu.core_type = #tpu.core_type<tc>, window_params = [{transform_indices = @transform_0, window_bounds = array<i64: 1, 10, 32>}, {pipeline_mode = #tpu.pipeline_mode<synchronous>, transform_indices = @transform_1, window_bounds = array<i64: 96, 32>}, {transform_indices = @transform_2, window_bounds = array<i64: 1, 8, 32>}]} {
    %c0 = arith.constant 0 : index
    %c0_0 = arith.constant 0 : index
    %c0_1 = arith.constant 0 : index
    %0 = vector.load %arg1[%c0, %c0_0, %c0_1] : memref<1x10x32xbf16, #tpu.memory_space<vmem>>, vector<1x10x32xbf16>
    %1 = vector.shape_cast %0 : vector<1x10x32xbf16> to vector<10x32xbf16>
    %2 = vector.extract_strided_slice %1 {offsets = [0, 0], sizes = [8, 32], strides = [1, 1]} : vector<10x32xbf16> to vector<8x32xbf16>
    %3 = vector.extract_strided_slice %1 {offsets = [1, 0], sizes = [8, 32], strides = [1, 1]} : vector<10x32xbf16> to vector<8x32xbf16>
    %4 = vector.extract_strided_slice %1 {offsets = [2, 0], sizes = [8, 32], strides = [1, 1]} : vector<10x32xbf16> to vector<8x32xbf16>
    %5 = tpu.concatenate %2, %3, %4 in 1 : vector<8x32xbf16>, vector<8x32xbf16>, vector<8x32xbf16> -> vector<8x96xbf16>
    %c0_2 = arith.constant 0 : index
    %c0_3 = arith.constant 0 : index
    %6 = vector.load %arg2[%c0_2, %c0_3] : memref<96x32xbf16, #tpu.memory_space<vmem>>, vector<96x32xbf16>
    %cst = arith.constant dense<0.000000e+00> : vector<8x32xf32>
    %7 = tpu.matmul %5, %6, %cst {dimension_numbers = #tpu.dot_dimension_numbers<[1], [0], [0], [1], [0, 0, 1, 1], [], []>} : vector<8x96xbf16>, vector<96x32xbf16>, vector<8x32xf32> -> vector<8x32xf32>
    %c0_4 = arith.constant 0 : index
    %c0_5 = arith.constant 0 : index
    %c0_6 = arith.constant 0 : index
    %8 = vector.load %arg3[%c0_4, %c0_5, %c0_6] : memref<1x8x32xf32, #tpu.memory_space<vmem>>, vector<1x8x32xf32>
    %9 = vector.shape_cast %8 : vector<1x8x32xf32> to vector<8x32xf32>
    %10 = vector.shape_cast %7 : vector<8x32xf32> to vector<1x8x32xf32>
    tpu.vector_store %arg3[%c0_4, %c0_5, %c0_6], %10 {strides = array<i32>} : memref<1x8x32xf32, #tpu.memory_space<vmem>>, vector<1x8x32xf32>,
    return
  }
  func.func @transform_0(%arg0: i32) -> (i32, i32, i32) {
    %c0_i32 = arith.constant 0 : i32
    %c0_i32_0 = arith.constant 0 : i32
    %c0_i32_1 = arith.constant 0 : i32
    return %arg0, %c0_i32, %c0_i32_0 : i32, i32, i32
  }
  func.func @transform_1(%arg0: i32) -> (i32, i32) {
    %c0_i32 = arith.constant 0 : i32
    %c0_i32_0 = arith.constant 0 : i32
    %c0_i32_1 = arith.constant 0 : i32
    return %c0_i32, %c0_i32_0 : i32, i32
  }
  func.func @transform_2(%arg0: i32) -> (i32, i32, i32) {
    %c0_i32 = arith.constant 0 : i32
    %c0_i32_0 = arith.constant 0 : i32
    %c0_i32_1 = arith.constant 0 : i32
    return %arg0, %c0_i32, %c0_i32_0 : i32, i32, i32
  }
}

module attributes {stable_mosaic.version = 11 : i64} {
  func.func @_matmul_kernel(%arg0: i32, %arg1: i32, %arg2: i32, %arg3: memref<16x64xbf16, #tpu.memory_space<vmem>>, %arg4: memref<64x32xbf16, #tpu.memory_space<vmem>>, %arg5: memref<1x32xf32, #tpu.memory_space<vmem>>, %arg6: memref<16x32xbf16, #tpu.memory_space<vmem>>, %arg7: memref<16x32xf32, #tpu.memory_space<vmem>>) attributes {dimension_semantics = [#tpu.dimension_semantics<parallel>, #tpu.dimension_semantics<parallel>, #tpu.dimension_semantics<arbitrary>], iteration_bounds = array<i64: 1, 1, 1>, scalar_prefetch = 0 : i64, scratch_operands = 1 : i64, tpu.core_type = #tpu.core_type<tc>, window_params = [{transform_indices = @transform_0, window_bounds = array<i64: 16, 64>}, {transform_indices = @transform_1, window_bounds = array<i64: 64, 32>}, {transform_indices = @transform_2, window_bounds = array<i64: 1, 32>}, {transform_indices = @transform_3, window_bounds = array<i64: 16, 32>}]} {
    %c0_i32 = arith.constant 0 : i32
    %0 = arith.cmpi eq, %arg2, %c0_i32 : i32
    %1 = arith.extui %0 : i1 to i32
    %c0_i32_0 = arith.constant 0 : i32
    %2 = arith.cmpi ne, %1, %c0_i32_0 : i32
    scf.if %2 {
      %cst_10 = arith.constant 0.000000e+00 : f32
      %12 = vector.broadcast %cst_10 : f32 to vector<16x32xf32>
      %c0_11 = arith.constant 0 : index
      %c0_12 = arith.constant 0 : index
      %13 = vector.load %arg7[%c0_11, %c0_12] : memref<16x32xf32, #tpu.memory_space<vmem>>, vector<16x32xf32>
      tpu.vector_store %arg7[%c0_11, %c0_12], %12 {strides = array<i32>} : memref<16x32xf32, #tpu.memory_space<vmem>>, vector<16x32xf32>,
    } else {
    }
    %c0 = arith.constant 0 : index
    %c0_1 = arith.constant 0 : index
    %3 = vector.load %arg7[%c0, %c0_1] : memref<16x32xf32, #tpu.memory_space<vmem>>, vector<16x32xf32>
    %c0_2 = arith.constant 0 : index
    %c0_3 = arith.constant 0 : index
    %4 = vector.load %arg3[%c0_2, %c0_3] : memref<16x64xbf16, #tpu.memory_space<vmem>>, vector<16x64xbf16>
    %c0_4 = arith.constant 0 : index
    %c0_5 = arith.constant 0 : index
    %5 = vector.load %arg4[%c0_4, %c0_5] : memref<64x32xbf16, #tpu.memory_space<vmem>>, vector<64x32xbf16>
    %cst = arith.constant dense<0.000000e+00> : vector<16x32xf32>
    %6 = tpu.matmul %4, %5, %cst {dimension_numbers = #tpu.dot_dimension_numbers<[1], [0], [0], [1], [0, 0, 1, 1], [], []>} : vector<16x64xbf16>, vector<64x32xbf16>, vector<16x32xf32> -> vector<16x32xf32>
    %7 = arith.addf %3, %6 : vector<16x32xf32>
    %c0_6 = arith.constant 0 : index
    %c0_7 = arith.constant 0 : index
    %8 = vector.load %arg7[%c0_6, %c0_7] : memref<16x32xf32, #tpu.memory_space<vmem>>, vector<16x32xf32>
    tpu.vector_store %arg7[%c0_6, %c0_7], %7 {strides = array<i32>} : memref<16x32xf32, #tpu.memory_space<vmem>>, vector<16x32xf32>,
    %c0_i32_8 = arith.constant 0 : i32
    %9 = arith.cmpi eq, %arg2, %c0_i32_8 : i32
    %10 = arith.extui %9 : i1 to i32
    %c0_i32_9 = arith.constant 0 : i32
    %11 = arith.cmpi ne, %10, %c0_i32_9 : i32
    scf.if %11 {
      %c0_10 = arith.constant 0 : index
      %c0_11 = arith.constant 0 : index
      %12 = vector.load %arg7[%c0_10, %c0_11] : memref<16x32xf32, #tpu.memory_space<vmem>>, vector<16x32xf32>
      %c0_12 = arith.constant 0 : index
      %c0_13 = arith.constant 0 : index
      %13 = vector.load %arg5[%c0_12, %c0_13] : memref<1x32xf32, #tpu.memory_space<vmem>>, vector<1x32xf32>
      %14 = vector.broadcast %13 : vector<1x32xf32> to vector<16x32xf32>
      %15 = arith.addf %12, %14 : vector<16x32xf32>
      %16 = arith.truncf %15 : vector<16x32xf32> to vector<16x32xbf16>
      %c0_14 = arith.constant 0 : index
      %c0_15 = arith.constant 0 : index
      %17 = vector.load %arg6[%c0_14, %c0_15] : memref<16x32xbf16, #tpu.memory_space<vmem>>, vector<16x32xbf16>
      tpu.vector_store %arg6[%c0_14, %c0_15], %16 {strides = array<i32>} : memref<16x32xbf16, #tpu.memory_space<vmem>>, vector<16x32xbf16>,
    } else {
    }
    return
  }
  func.func @transform_0(%arg0: i32, %arg1: i32, %arg2: i32) -> (i32, i32) {
    %c0_i32 = arith.constant 0 : i32
    return %arg0, %arg2 : i32, i32
  }
  func.func @transform_1(%arg0: i32, %arg1: i32, %arg2: i32) -> (i32, i32) {
    %c0_i32 = arith.constant 0 : i32
    return %arg2, %arg1 : i32, i32
  }
  func.func @transform_2(%arg0: i32, %arg1: i32, %arg2: i32) -> (i32, i32) {
    %c0_i32 = arith.constant 0 : i32
    %c0_i32_0 = arith.constant 0 : i32
    return %c0_i32, %arg1 : i32, i32
  }
  func.func @transform_3(%arg0: i32, %arg1: i32, %arg2: i32) -> (i32, i32) {
    %c0_i32 = arith.constant 0 : i32
    return %arg0, %arg1 : i32, i32
  }
}

</mosaic_0001>

<bundles_post_ra>
// kernel: bert_cnn_forward.17
= control target key start
LH: loop header
LB: loop body
LE: loop exit
PB: predicated region body
PF: predicated region fallthrough
CT: control target
= control target key end

     0   :  { %vm19_vm0 = vcmask 785408   ;;  %v151_v0 = vmov 0.0   ;;  %vm152_vm1 = vmmov 0   ;;  %vm47_vm2 = vcmask 261120   ;;  %s195_s1 = inlined_call_operand.vmem [shape: bf16[32,96], index: 1, kind: input, shape index: {}]   ;;  %s196_s0 = inlined_call_operand.vmem [shape: bf16[16,32], index: 0, kind: input, shape index: {}]   ;;  %s197_s2 = inlined_call_operand.vmem [shape: f32[1,96], index: 2, kind: input, shape index: {}]   ;;  %s198_s3 = inlined_call_operand.vmem [shape: bf16[16,96], index: 3, kind: output, shape index: {}]  }
   0x1   :  { %138 = vmatprep.subr.bf16.mxu0 %v151_v0  ;;  %v148_v1 = vld [vmem:[%s195_s1] sm:$0xff]   ;;  %142 = vmatprep.mubr.msk.bf16.mxu0 %vm152_vm1, %v151_v0  ;;  %20 = vst.msk [vmem:[#allocation2] sm:$0xff] %vm19_vm0, %v151_v0  ;;  %21 = vst.msk [vmem:[#allocation2 + $0x8] sm:$0xff] %vm19_vm0, %v151_v0  ;;  %v149_v2 = vld [vmem:[%s195_s1 + $0x8] sm:$0xff]   ;;  %vm119_vm3 = vcmask 781312  }
   0x2   :  { %139 = vmatpush3.bf16.msra.mxu0 %v148_v1  ;;  %v150_v3 = vld [vmem:[%s196_s0] sm:$0xff]  }
   0x3   :  { %140 = vmatprep.subr.bf16.mxu0 %v151_v0  ;;  %v130_v12 = vld [vmem:[%s197_s2] ss:$0 sm:$0xff] }
   0x6   :  { %141 = vmatpush3.bf16.msra.mxu0 %v149_v2 }
   0x8   :  { %v22_v4 = vld [vmem:[#allocation2] sm:$0xff]  ;;  %v23_v6 = vld [vmem:[#allocation2 + $0x8] sm:$0xff] }
   0x9   :  { %143 = vmatmul.mubr.msk.bf16.vlgmr.msra.gmra.mrb[0].mxu0 %vm47_vm2, %v150_v3 }
  0xdc   :  { %v85_v5 = vpop.f32.mrb[0].mxu0 }
  0xdd   :  { %v92_v7 = vadd.f32 %v85_v5, %v22_v4  ;;  %v144_v8 = vpop.f32.mrb[1].mxu0 }
  0xde   :  { %v88_v9 = vpop.f32.mrb[2].mxu0 }
  0xdf   :  { %95 = vst.msk [vmem:[#allocation2] sm:$0xff] %vm19_vm0, %v92_v7  ;;  %v93_v10 = vadd.f32 %v88_v9, %v23_v6  ;;  %v145_v11 = vpop.f32.mrb[3].mxu0 }
  0xe1   :  { %96 = vst.msk [vmem:[#allocation2 + $0x8] sm:$0xff] %vm19_vm0, %v93_v10 }
  0xe6   :  { %v100_v13 = vld [vmem:[#allocation2] sm:$0xff] }
  0xe7   :  { %v109_v14 = vadd.f32 %v130_v12, %v100_v13 }
  0xe8   :  { %v101_v15 = vld [vmem:[#allocation2 + $0x8] sm:$0xff] }
  0xe9   :  { %v133_v16 = vpack.c.bf16 %v109_v14, %v109_v14  ;;  %v110_v17 = vadd.f32 %v130_v12, %v101_v15 }
  0xeb   :  { %120 = vst.msk [vmem:[%s198_s3] sm:$0xf] %vm119_vm3, %v133_v16  ;;  %v134_v18 = vpack.c.bf16 %v110_v17, %v110_v17 }
  0xed   :  { %121 = vst.msk [vmem:[%s198_s3 + $0x4] sm:$0xf] %vm119_vm3, %v134_v18 }

// kernel: bert_cnn_forward.18
= control target key start
LH: loop header
LB: loop body
LE: loop exit
PB: predicated region body
PF: predicated region fallthrough
CT: control target
= control target key end

     0   :  { %s466_s12 = smov 0   ;;  %s500_s0 = inlined_call_operand.vmem [shape: bf16[8,8,8], index: 0, kind: input, shape index: {}]   ;;  %s501_s1 = inlined_call_operand.vmem [shape: bf16[8,8,8], index: 1, kind: input, shape index: {}]   ;;  %s502_s2 = inlined_call_operand.vmem [shape: bf16[8,8,8], index: 2, kind: input, shape index: {}]   ;;  %s503_s3 = inlined_call_operand.vmem [shape: bf16[8,8,8], index: 3, kind: output, shape index: {}]  }
   0x1 LB: > { %s393_s13 = sadd.s32 4294967295, %s442_s12   ;;  %p397_p0 = scmp.ge.s32.totalorder %s442_s12, 1  ;;  %s442_s12 = sphi %s466_s12, %s13_s12  }
   0x2   : > { %p154_p1 = scmp.lt.s32.totalorder %s442_s12, 9 }
   0x4   : > { %p155_p2 = pnand %p397_p0, %p154_p1 }
   0x5   : > { %p184_p3 = scmp.lt.s32.totalorder (!%p155_p2), %s393_s13, 7  ;;  %v444_v0 = vmov (!%p155_p2), 0.0   ;;  %vm445_vm0 = vmmov (!%p155_p2), 0   ;;  %vm207_vm1 = vcmask (!%p155_p2), 64512   ;;  %vm268_vm2 = vcmask (!%p155_p2), 1043456  }
   0x6   : > { %158 = sbr.rel (%p155_p2) target bundleno = 614 (0x266), region = 32  ;;  %410 = vmatprep.subr.bf16.mxu0 (!%p155_p2), %v444_v0  ;;  %412 = vmatprep.mubr.msk.bf16.mxu0 (!%p155_p2), %vm445_vm0, %v444_v0  ;;  %vm314_vm3 = vcmask (!%p155_p2), 60416  }
   0x7   : > { %416 = vmatprep.subr.bf16.mxu1 (!%p155_p2), %v444_v0  ;;  %418 = vmatprep.mubr.msk.bf16.mxu1 (!%p155_p2), %vm445_vm0, %v444_v0 }
   0xd   : > { %s505_s13 = smov (!%p184_p3, %s393_s13), 7 }
   0xe   : > { %s474_s14 = sshll.u32 %s505_s13, 2 }
   0xf   : > { %s191_s17 = scalar_lea.vmem %s501_s1, %s474_s14  ;;  %s187_s20 = scalar_lea.vmem %s500_s0, %s474_s14 }
  0x10   : > { %v201_v1 = vld [vmem:[%s191_s17] sm:$0xf]  ;;  %s195_s23 = scalar_lea.vmem %s502_s2, %s474_s14  ;;  %s199_s26 = scalar_lea.vmem %s503_s3, %s474_s14 }
  0x11   : > { %v203_v2 = vld [vmem:[%s187_s20] sm:$0xf]  ;;  %v212_v3 = vsel %vm207_vm1, %v201_v1, 0 }
  0x12   : > { %v204_v4 = vunpack.c.l.bf16 %v203_v2  ;;  %411 = vmatpush3.bf16.xpose.msra.mxu0 %v212_v3  ;;  %v202_v12 = vld [vmem:[%s195_s23] sm:$0xf] }
  0x13   : > { %v270_v13 = vsel %vm268_vm2, %v202_v12, 0 }
  0x14   : > { %v205_v5 = vmul.f32 0.35355338, %v204_v4  ;;  %417 = vmatpush3.bf16.msra.mxu1 %v270_v13 }
  0x16   : > { %v206_v6 = vpack.c.bf16 %v205_v5, %v205_v5 }
  0x19   : > { %413 = vmatmul.mubr.msk.bf16.vlgmr.msra.gmra.mrb[0].mxu0 %vm207_vm1, %v206_v6 }
  0xec   : > { %v248_v7 = vpop.f32.mrb[0].mxu0 }
  0xed   : > { %v414_v8 = vpop.f32.mrb[1].mxu0  ;;  %v254_v9 = vsel %vm207_vm1, %v248_v7, -inf }
  0xee   : > { %255 = vmax.xlane.f32.xlu0 %v254_v9  ;;  %v251_v10 = vpop.f32.mrb[2].mxu0 }
  0xef   : > { %v415_v11 = vpop.f32.mrb[3].mxu0 }
 0x17b   : > { %v256_v14 = vpop.xlane.xlu0 %255 }
 0x17c   : > { %v257_v15 = vsub.f32 %v248_v7, %v256_v14 }
 0x17e   : > { %v258_v16 = vmul.f32 1.442695, %v257_v15 }
 0x180   : > { %432 = vpow2.f32 %v258_v16 }
 0x18a   : > { %v433_v17 = vpop.eup %432 }
 0x18b   : > { %v260_v18 = vsel %vm207_vm1, %v433_v17, 0.0  ;;  %v264_v19 = vpack.c.bf16 %v433_v17, %v433_v17 }
 0x18c   : > { %261 = vadd.xlane.f32.xlu0 %v260_v18 }
 0x18d   : > { %419 = vmatmul.mubr.msk.bf16.vlgmr.msra.gmra.mrb[0].mxu1 %vm207_vm1, %v264_v19 }
 0x219   : > { %v262_v20 = vpop.xlane.xlu0 %261 }
 0x21a   : > { %434 = vrcp.f32 %v262_v20 }
 0x224   : > { %v435_v21 = vpop.eup %434 }
 0x260   : > { %v306_v22 = vpop.f32.mrb[0].mxu1 }
 0x261   : > { %v312_v23 = vmul.f32 %v435_v21, %v306_v22  ;;  %v420_v24 = vpop.f32.mrb[1].mxu1 }
 0x262   : > { %v309_v25 = vpop.f32.mrb[2].mxu1 }
 0x263   : > { %v313_v26 = vpack.c.bf16 %v312_v23, %v312_v23  ;;  %v421_v27 = vpop.f32.mrb[3].mxu1 }
 0x265   : > { %315 = vst.msk [vmem:[%s199_s26] sm:$0xf] %vm314_vm3, %v313_v26 }
 0x266 PF: > { %s13_s12 = sadd.s32 1, %s442_s12  }
 0x267   : > { %p10_p4 = scmp.ge.s32.totalorder %s13_s12, 10  }
 0x269   :  { %12 = sbr.rel (!%p10_p4) target bundleno = 1 (0x1), region = 68 }

// kernel: bert_cnn_forward.16
= control target key start
LH: loop header
LB: loop body
LE: loop exit
PB: predicated region body
PF: predicated region fallthrough
CT: control target
= control target key end

     0   :  { %vm18_vm0 = vcmask 261120   ;;  %vm70_vm1 = vcmask 257024   ;;  %s129_s0 = inlined_call_operand.vmem [shape: f32[16,32], index: 0, kind: input, shape index: {}]   ;;  %s130_s1 = inlined_call_operand.vmem [shape: f32[1,32], index: 1, kind: input, shape index: {}]   ;;  %s131_s2 = inlined_call_operand.vmem [shape: f32[1,32], index: 2, kind: input, shape index: {}]   ;;  %s132_s3 = inlined_call_operand.vmem [shape: bf16[16,32], index: 3, kind: output, shape index: {}]  }
   0x1   :  { %v14_v0 = vld [vmem:[%s129_s0] sm:$0xff]  ;;  %v15_v1 = vld [vmem:[%s129_s0 + $0x8] sm:$0xff] }
   0x2   :  { %v19_v2 = vsel %vm18_vm0, %v14_v0, 0.0  ;;  %v22_v3 = vsel %vm18_vm0, %v15_v1, 0.0  ;;  %v77_v21 = vld [vmem:[%s130_s1] ss:$0 sm:$0xff] }
   0x3   :  { %20 = vadd.xlane.f32.xlu0 %v19_v2  ;;  %v78_v23 = vld [vmem:[%s131_s2] ss:$0 sm:$0xff] }
   0x7   :  { %23 = vadd.xlane.f32.xlu0 %v22_v3 }
  0x90   :  { %v21_v4 = vpop.xlane.xlu0 %20 }
  0x91   :  { %v26_v5 = vmul.f32 0.03125, %v21_v4 }
  0x93   :  { %v28_v6 = vsub.f32 %v14_v0, %v26_v5 }
  0x94   :  { %v24_v7 = vpop.xlane.xlu0 %23 }
  0x95   :  { %v27_v8 = vmul.f32 0.03125, %v24_v7  ;;  %v30_v9 = vmul.f32 %v28_v6, %v28_v6 }
  0x97   :  { %v29_v10 = vsub.f32 %v15_v1, %v27_v8  ;;  %v32_v11 = vsel %vm18_vm0, %v30_v9, 0.0 }
  0x98   :  { %33 = vadd.xlane.f32.xlu1 %v32_v11 }
  0x99   :  { %v31_v12 = vmul.f32 %v29_v10, %v29_v10 }
  0x9b   :  { %v35_v13 = vsel %vm18_vm0, %v31_v12, 0.0 }
  0x9c   :  { %36 = vadd.xlane.f32.xlu1 %v35_v13 }
 0x125   :  { %v34_v14 = vpop.xlane.xlu1 %33 }
 0x126   :  { %v38_v15 = vmul.f32 0.03125, %v34_v14 }
 0x128   :  { %v40_v16 = vadd.f32 1e-12, %v38_v15 }
 0x129   :  { %v37_v17 = vpop.xlane.xlu1 %36 }
 0x12a   :  { %83 = vrsqrt.f32 %v40_v16  ;;  %v39_v18 = vmul.f32 0.03125, %v37_v17 }
 0x12c   :  { %v41_v19 = vadd.f32 1e-12, %v39_v18 }
 0x12e   :  { %85 = vrsqrt.f32 %v41_v19 }
 0x134   :  { %v84_v20 = vpop.eup %83 }
 0x135   :  { %v44_v22 = vmul.f32 %v84_v20, %v28_v6 }
 0x137   :  { %v52_v24 = vmul.f32 %v77_v21, %v44_v22 }
 0x138   :  { %v86_v25 = vpop.eup %85 }
 0x139   :  { %v60_v26 = vadd.f32 %v78_v23, %v52_v24  ;;  %v45_v27 = vmul.f32 %v86_v25, %v29_v10 }
 0x13b   :  { %v81_v28 = vpack.c.bf16 %v60_v26, %v60_v26  ;;  %v53_v29 = vmul.f32 %v77_v21, %v45_v27 }
 0x13d   :  { %71 = vst.msk [vmem:[%s132_s3] sm:$0xf] %vm70_vm1, %v81_v28  ;;  %v61_v30 = vadd.f32 %v78_v23, %v53_v29 }
 0x13f   :  { %v82_v31 = vpack.c.bf16 %v61_v30, %v61_v30 }
 0x141   :  { %72 = vst.msk [vmem:[%s132_s3 + $0x4] sm:$0xf] %vm70_vm1, %v82_v31 }

// kernel: bert_cnn_forward.19
= control target key start
LH: loop header
LB: loop body
LE: loop exit
PB: predicated region body
PF: predicated region fallthrough
CT: control target
= control target key end

     0   :  { %vm19_vm0 = vcmask 261120   ;;  %v150_v0 = vmov 0.0   ;;  %vm151_vm1 = vmmov 0   ;;  %vm118_vm2 = vcmask 257024   ;;  %s195_s1 = inlined_call_operand.vmem [shape: bf16[32,32], index: 1, kind: input, shape index: {}]   ;;  %s196_s0 = inlined_call_operand.vmem [shape: bf16[16,32], index: 0, kind: input, shape index: {}]   ;;  %s197_s2 = inlined_call_operand.vmem [shape: f32[1,32], index: 2, kind: input, shape index: {}]   ;;  %s198_s3 = inlined_call_operand.vmem [shape: bf16[16,32], index: 3, kind: output, shape index: {}]  }
   0x1   :  { %137 = vmatprep.subr.bf16.mxu0 %v150_v0  ;;  %v147_v1 = vld [vmem:[%s195_s1] sm:$0xff]   ;;  %141 = vmatprep.mubr.msk.bf16.mxu0 %vm151_vm1, %v150_v0  ;;  %20 = vst.msk [vmem:[#allocation2] sm:$0xff] %vm19_vm0, %v150_v0  ;;  %21 = vst.msk [vmem:[#allocation2 + $0x8] sm:$0xff] %vm19_vm0, %v150_v0  ;;  %v148_v2 = vld [vmem:[%s195_s1 + $0x8] sm:$0xff]  }
   0x2   :  { %138 = vmatpush3.bf16.msra.mxu0 %v147_v1  ;;  %v149_v3 = vld [vmem:[%s196_s0] sm:$0xff]  }
   0x3   :  { %139 = vmatprep.subr.bf16.mxu0 %v150_v0  ;;  %v129_v12 = vld [vmem:[%s197_s2] ss:$0 sm:$0xff] }
   0x6   :  { %140 = vmatpush3.bf16.msra.mxu0 %v148_v2 }
   0x8   :  { %v22_v4 = vld [vmem:[#allocation2] sm:$0xff]  ;;  %v23_v6 = vld [vmem:[#allocation2 + $0x8] sm:$0xff] }
   0x9   :  { %142 = vmatmul.mubr.msk.bf16.vlgmr.msra.gmra.mrb[0].mxu0 %vm19_vm0, %v149_v3 }
  0xdc   :  { %v85_v5 = vpop.f32.mrb[0].mxu0 }
  0xdd   :  { %v92_v7 = vadd.f32 %v85_v5, %v22_v4  ;;  %v143_v8 = vpop.f32.mrb[1].mxu0 }
  0xde   :  { %v88_v9 = vpop.f32.mrb[2].mxu0 }
  0xdf   :  { %94 = vst.msk [vmem:[#allocation2] sm:$0xff] %vm19_vm0, %v92_v7  ;;  %v93_v10 = vadd.f32 %v88_v9, %v23_v6  ;;  %v144_v11 = vpop.f32.mrb[3].mxu0 }
  0xe1   :  { %95 = vst.msk [vmem:[#allocation2 + $0x8] sm:$0xff] %vm19_vm0, %v93_v10 }
  0xe6   :  { %v99_v13 = vld [vmem:[#allocation2] sm:$0xff] }
  0xe7   :  { %v108_v14 = vadd.f32 %v129_v12, %v99_v13 }
  0xe8   :  { %v100_v15 = vld [vmem:[#allocation2 + $0x8] sm:$0xff] }
  0xe9   :  { %v132_v16 = vpack.c.bf16 %v108_v14, %v108_v14  ;;  %v109_v17 = vadd.f32 %v129_v12, %v100_v15 }
  0xeb   :  { %119 = vst.msk [vmem:[%s198_s3] sm:$0xf] %vm118_vm2, %v132_v16  ;;  %v133_v18 = vpack.c.bf16 %v109_v17, %v109_v17 }
  0xed   :  { %120 = vst.msk [vmem:[%s198_s3 + $0x4] sm:$0xf] %vm118_vm2, %v133_v18 }

// kernel: bert_cnn_forward.20
= control target key start
LH: loop header
LB: loop body
LE: loop exit
PB: predicated region body
PF: predicated region fallthrough
CT: control target
= control target key end

     0   :  { %vm29_vm0 = vcmask 261120   ;;  %vm81_vm1 = vcmask 257024   ;;  %s153_s0 = inlined_call_operand.vmem [shape: bf16[16,32], index: 0, kind: input, shape index: {}]   ;;  %s154_s1 = inlined_call_operand.vmem [shape: bf16[16,32], index: 1, kind: input, shape index: {}]   ;;  %s155_s2 = inlined_call_operand.vmem [shape: f32[1,32], index: 2, kind: input, shape index: {}]   ;;  %s156_s3 = inlined_call_operand.vmem [shape: f32[1,32], index: 3, kind: input, shape index: {}]   ;;  %s157_s4 = inlined_call_operand.vmem [shape: bf16[16,32], index: 4, kind: output, shape index: {}]  }
   0x1   :  { %v95_v0 = vld [vmem:[%s153_s0] sm:$0xff]  }
   0x2   :  { %v99_v1 = vld [vmem:[%s154_s1] sm:$0xff]   ;;  %v96_v2 = vunpack.c.l.bf16 %v95_v0  ;;  %v97_v4 = vunpack.c.h.bf16 %v95_v0 }
   0x3   :  { %v100_v3 = vunpack.c.l.bf16 %v99_v1  ;;  %v101_v5 = vunpack.c.h.bf16 %v99_v1  ;;  %v88_v27 = vld [vmem:[%s155_s2] ss:$0 sm:$0xff] }
   0x4   :  { %v89_v29 = vld [vmem:[%s156_s3] ss:$0 sm:$0xff] }
   0x5   :  { %v25_v6 = vadd.f32 %v100_v3, %v96_v2  ;;  %v26_v7 = vadd.f32 %v101_v5, %v97_v4 }
   0x7   :  { %v30_v8 = vsel %vm29_vm0, %v25_v6, 0.0  ;;  %v33_v9 = vsel %vm29_vm0, %v26_v7, 0.0 }
   0x8   :  { %31 = vadd.xlane.f32.xlu0 %v30_v8 }
   0xc   :  { %34 = vadd.xlane.f32.xlu0 %v33_v9 }
  0x95   :  { %v32_v10 = vpop.xlane.xlu0 %31 }
  0x96   :  { %v37_v11 = vmul.f32 0.03125, %v32_v10 }
  0x98   :  { %v39_v12 = vsub.f32 %v25_v6, %v37_v11 }
  0x99   :  { %v35_v13 = vpop.xlane.xlu0 %34 }
  0x9a   :  { %v38_v14 = vmul.f32 0.03125, %v35_v13  ;;  %v41_v15 = vmul.f32 %v39_v12, %v39_v12 }
  0x9c   :  { %v40_v16 = vsub.f32 %v26_v7, %v38_v14  ;;  %v43_v17 = vsel %vm29_vm0, %v41_v15, 0.0 }
  0x9d   :  { %44 = vadd.xlane.f32.xlu1 %v43_v17 }
  0x9e   :  { %v42_v18 = vmul.f32 %v40_v16, %v40_v16 }
  0xa0   :  { %v46_v19 = vsel %vm29_vm0, %v42_v18, 0.0 }
  0xa1   :  { %47 = vadd.xlane.f32.xlu1 %v46_v19 }
 0x12a   :  { %v45_v20 = vpop.xlane.xlu1 %44 }
 0x12b   :  { %v49_v21 = vmul.f32 0.03125, %v45_v20 }
 0x12d   :  { %v51_v22 = vadd.f32 1e-12, %v49_v21 }
 0x12e   :  { %v48_v23 = vpop.xlane.xlu1 %47 }
 0x12f   :  { %102 = vrsqrt.f32 %v51_v22  ;;  %v50_v24 = vmul.f32 0.03125, %v48_v23 }
 0x131   :  { %v52_v25 = vadd.f32 1e-12, %v50_v24 }
 0x133   :  { %104 = vrsqrt.f32 %v52_v25 }
 0x139   :  { %v103_v26 = vpop.eup %102 }
 0x13a   :  { %v55_v28 = vmul.f32 %v103_v26, %v39_v12 }
 0x13c   :  { %v63_v30 = vmul.f32 %v88_v27, %v55_v28 }
 0x13d   :  { %v105_v31 = vpop.eup %104 }
 0x13e   :  { %v71_v32 = vadd.f32 %v89_v29, %v63_v30  ;;  %v56_v33 = vmul.f32 %v105_v31, %v40_v16 }
 0x140   :  { %v92_v34 = vpack.c.bf16 %v71_v32, %v71_v32  ;;  %v64_v35 = vmul.f32 %v88_v27, %v56_v33 }
 0x142   :  { %82 = vst.msk [vmem:[%s157_s4] sm:$0xf] %vm81_vm1, %v92_v34  ;;  %v72_v36 = vadd.f32 %v89_v29, %v64_v35 }
 0x144   :  { %v93_v37 = vpack.c.bf16 %v72_v36, %v72_v36 }
 0x146   :  { %83 = vst.msk [vmem:[%s157_s4 + $0x4] sm:$0xf] %vm81_vm1, %v93_v37 }

// kernel: bert_cnn_forward.31
= control target key start
LH: loop header
LB: loop body
LE: loop exit
PB: predicated region body
PF: predicated region fallthrough
CT: control target
= control target key end

     0   :  { %7 = vsyncpa [#allocation3], 0  ;;  %s629_s0 = inlined_call_operand.vmem [shape: bf16[2,10,32], index: 0, kind: input, shape index: {}]   ;;  %s630_s1 = inlined_call_operand.vmem [shape: bf16[96,32], index: 1, kind: input, shape index: {}]   ;;  %s631_s2 = inlined_call_operand.hbm [shape: f32[2,8,32], index: 2, kind: output, shape index: {}]  }
   0x1   :  { %9 = vsyncpa [#allocation3 + $0x1], 0  ;;  %s511_s9 = smov 0   ;;  %s513_s10 = smov 0  }
   0x2   :  { %s515_s11 = smov 0   ;;  %s517_s12 = smov 0  }
   0x3 LB: > { %s532_s13 = sadd.s32 4294967295, %s489_s12   ;;  %s334_s14 = sadd.s32 4294967294, %s489_s12   ;;  %s489_s12 = sphi %s517_s12, %s637_s12   ;;  %s485_s11 = sphi %s515_s11, %s636_s11   ;;  %s481_s10 = sphi %s513_s10, %s635_s10   ;;  %s477_s9 = sphi %s511_s9, %s634_s9  }
   0x4   : > { %s536_s15 = sadd.s32 1, %s489_s12   ;;  %s69_s16 = sadd.s32 1, %s485_s11 }
   0x5   : > { %s66_s17 = ssub.s32 %s489_s12, %s536_s15  ;;  %p79_p0 = scmp.ne.s32.totalorder %s485_s11, %s481_s10 }
   0x6   : > { %p67_p1 = scmp.eq.s32.totalorder %s66_s17, 0  ;;  %p80_p2 = scmp.eq.s32.totalorder %s532_s13, 1 }
   0x7   : > { %p85_p3 = scmp.ne.s32.totalorder %s481_s10, %s477_s9  ;;  %p86_p4 = scmp.eq.s32.totalorder %s334_s14, 1 }
   0x8   : > { %s547_s18 = scalar_select %p67_p1, %s485_s11, %s69_s16  }
   0x9   : > { %p549_p5 = por %p80_p2, %p79_p0  ;;  %p553_p6 = por %p86_p4, %p85_p3 }
   0xa   : > { %p337_p7 = scmp.ge.s32.totalorder %s489_s12, 1  ;;  %p115_p8 = scmp.lt.s32.totalorder %s489_s12, 3 }
   0xc   : > { %p116_p9 = pnand %p337_p7, %p115_p8 }
   0xd   : > { %p137_p10 = scmp.lt.s32.totalorder (!%p116_p9), %s532_s13, 1  ;;  %v421_v0 = vld [vmem:[%s630_s1] sm:$0xff] (!%p116_p9)   ;;  %v491_v1 = vmov (!%p116_p9), 0.0   ;;  %v422_v2 = vld [vmem:[%s630_s1 + $0x8] sm:$0xff] (!%p116_p9)   ;;  %v423_v5 = vld [vmem:[%s630_s1 + $0x10] sm:$0xff] (!%p116_p9)   ;;  %vm492_vm0 = vmmov (!%p116_p9), 0  }
   0xe   : > { %119 = sbr.rel (%p116_p9) target bundleno = 381 (0x17d), region = 28  ;;  %361 = vmatprep.subr.bf16.mxu0 (!%p116_p9), %v491_v1  ;;  %373 = vmatprep.mubr.msk.bf16.mxu0 (!%p116_p9), %vm492_vm0, %v491_v1  ;;  %v424_v9 = vld [vmem:[%s630_s1 + $0x18] sm:$0xff] (!%p116_p9)   ;;  %v425_v12 = vld [vmem:[%s630_s1 + $0x20] sm:$0xff] (!%p116_p9)   ;;  %s493_s8 = smov (!%p116_p9), 32   ;;  %v426_v14 = vld [vmem:[%s630_s1 + $0x28] sm:$0xff] (!%p116_p9)   ;;  %vm162_vm1 = vcmask (!%p116_p9), 261120  }
   0xf   : > { %362 = vmatpush3.bf16.msra.mxu0 (!%p116_p9), %v421_v0  ;;  %s494_s17 = smov (!%p116_p9), 64   ;;  %vm166_vm2 = vcmask (!%p116_p9), 523264   ;;  %vm217_vm3 = vcmask (!%p116_p9), 785408   ;;  %s134_s21 = sand.u32 (!%p116_p9), 1, %s481_s10  }
  0x10   : > { %363 = vmatprep.subr.bf16.mxu0 (!%p116_p9), %v491_v1  ;;  %s338_s22 = sshll.u32 (!%p116_p9), %s134_s21, 3 }
  0x11   : > { %s136_s24 = scalar_lea.vmem (!%p116_p9), [#allocation2], %s338_s22 }
  0x12   : > { %s275_s25 = sshll.u32 (!%p116_p9), %s136_s24, 4  ;;  %s589_s25 = int_to_ptr.vmem [resolvable:$true] %s275_s25 }
  0x13   : > { %364 = vmatpush3.bf16.msra.mxu0 (!%p116_p9), %v422_v2  ;;  %s427_s30 = scalar_lea.vmem (!%p116_p9), %s589_s25, 128 }
  0x14   : > { %365 = vmatprep.subr.bf16.mxu0 (!%p116_p9), %v491_v1  ;;  %p428_p11 = scmp.ne.s32.totalorder (!%p116_p9), %s589_s25, %s427_s30 }
  0x15   : > { %s138_s23 = scalar_select %p137_p10, %s532_s13, 1 }
  0x16   : > { %p429_p12 = pnand %p428_p11, %p549_p5 }
  0x17   : > { %s353_s26 = sshll.u32 %s138_s23, 3  ;;  %366 = vmatpush3.bf16.msra.mxu0 %v423_v5  ;;  %s350_s23 = sshll.u32 %s532_s13, 7 }
  0x18   : > { %s141_s29 = scalar_lea.vmem %s629_s0, %s353_s26  ;;  %367 = vmatprep.subr.bf16.mxu0 %v491_v1  ;;  %s587_s28 = scalar_lea.hbm %s631_s2, %s350_s23 }
  0x19   : > { %v143_v3 = vld [vmem:[%s141_s29] sm:$0xf]  ;;  %v144_v4 = vld [vmem:[%s141_s29 + $0x4] sm:$0x1]  ;;  %s262_s29 = scalar_lea.sflag [#allocation3], %s134_s21  ;;  %p430_p13 = pneg %p429_p12 }
  0x1a   : > { %v341_v6 = vcombine.low %v143_v3, %v144_v4  ;;  %s495_s13 = smov [#allocation2]  }
  0x1b   : > { %368 = vmatpush3.bf16.msra.mxu0 %v424_v9  ;;  %s431_s3 = sshll.u32 %s495_s13, 4  ;;  %s432_s3 = int_to_ptr.vmem [resolvable:$false] %s431_s3 }
  0x1c   : > { %v151_v7 = vshrl.u32 %v341_v6, 16  ;;  %v153_v8 = vshll.u32 %v341_v6, 16  ;;  %v159_v13 = vrot.slane %v341_v6, 1  ;;  %369 = vmatprep.subr.bf16.mxu0 %v491_v1  ;;  %s433_s4 = scalar_lea.vmem %s432_s3, 256  ;;  %p434_p0 = scmp.lt.s32.totalorder %s589_s25, %s432_s3 }
  0x1d   : > { %p435_p1 = scmp.lt.s32.totalorder %s433_s4, %s427_s30 }
  0x1e   : > { %v155_v10 = vrot.slane %v153_v8, 1 }
  0x1f   : > { %370 = vmatpush3.bf16.msra.mxu0 %v425_v12  ;;  %p436_p2 = por %p435_p1, %p434_p0 }
  0x20   : > { %v156_v11 = vor.u32 %v155_v10, %v151_v7  ;;  %371 = vmatprep.subr.bf16.mxu0 %v491_v1 }
  0x21   : > { %p437_p3 = pnand %p436_p2, %p430_p13 }
  0x22   : > { %157 = vrot.lane.b32.xlu0 %v156_v11, %s493_s8 }
  0x23   : > { %372 = vmatpush3.bf16.msra.mxu0 %v426_v14 }
  0x26   : > { %160 = vrot.lane.b32.xlu0 %v159_v13, %s494_s17 }
  0x94   : > { %v158_v15 = vpop.permute.xlu0 %157 }
  0x95   : > { %v165_v16 = vsel %vm162_vm1, %v143_v3, %v158_v15 }
  0x98   : > { %v161_v17 = vpop.permute.xlu0 %160 }
  0x99   : > { %v168_v18 = vsel %vm166_vm2, %v165_v16, %v161_v17 }
  0x9a   : > { %374 = vmatmul.mubr.msk.bf16.vlgmr.msra.gmra.mrb[0].mxu0 %vm217_vm3, %v168_v18 }
 0x16d   : > { %v254_v19 = vpop.f32.mrb[0].mxu0 }
 0x16e   : > { %260 = vst.msk [vmem:[%s136_s24] sm:$0xff] %vm162_vm1, %v254_v19  ;;  %v375_v20 = vpop.f32.mrb[1].mxu0 }
 0x16f   : > { %v257_v21 = vpop.f32.mrb[2].mxu0 }
 0x170   : > { %440 = shalt.err (!%p437_p3)
}
 0x171   : > { %s441_s5 = scalar_lea.hbm %s587_s28, 128  ;;  %s445_s8 = scalar_lea.hbm %s631_s2, 256 }
 0x172   : > { %p442_p4 = scmp.ne.s32.totalorder %s587_s28, %s441_s5  ;;  %p446_p9 = scmp.lt.u32.totalorder %s587_s28, %s631_s2 }
 0x173   : > { %p447_p10 = scmp.lt.u32.totalorder %s445_s8, %s441_s5  ;;  %p449_p12 = scmp.lt.u32.totalorder %s441_s5, %s587_s28 }
 0x174   : > { %p443_p7 = pnand %p442_p4, %p549_p5 }
 0x175   : > { %p448_p11 = por %p447_p10, %p446_p9 }
 0x176   : > { %p444_p8 = pneg %p443_p7 }
 0x177   : > { %p450_p13 = por %p449_p12, %p448_p11 }
 0x179   : > { %p451_p0 = pnand %p450_p13, %p444_p8 }
 0x17b   : > { %454 = shalt.err (!%p451_p0)
}
 0x17c   : > { %377 = dma.vmem_to_hbm [thread:$0]  (%p549_p5), %s589_s25, 128, %s587_s28, %s262_s29   ;;  %v376_v22 = vpop.f32.mrb[3].mxu0 }
 0x17d PF: > { %p383_p1 = scmp.ge.s32.totalorder %s489_s12, 2  ;;  %s287_s17 = sand.u32 1, %s477_s9  }
 0x17e   : > { %s288_s21 = scalar_lea.sflag [#allocation3], %s287_s17 }
 0x17f   : > { %p380_p2 = pnand %p383_p1, %p553_p6 }
 0x181   : > { %472 = dma.done.wait (!%p380_p2), %s288_s21, 128  }
 0x182   : > { %474 = vsyncadd (!%p380_p2), %s288_s21, 4294967168  ;;  %p12_p3 = scmp.ge.s32.totalorder %s536_s15, 4   ;;  %s634_s9 = smov %s481_s10 }
 0x183   : > { %s635_s10 = smov %s485_s11  ;;  %s636_s11 = smov %s547_s18 }
 0x184   : > { %s637_s12 = smov %s536_s15  ;;  %14 = sbr.rel (!%p12_p3) target bundleno = 3 (0x3), region = 63 }
 0x18b   :  { %293 = vsyncpa [#allocation3], 1 }
 0x18c   :  { %295 = vsyncpa [#allocation3 + $0x1], 1 }

// kernel: bert_cnn_forward.22
= control target key start
LH: loop header
LB: loop body
LE: loop exit
PB: predicated region body
PF: predicated region fallthrough
CT: control target
= control target key end

     0   :  { %vm19_vm0 = vcmask 261120   ;;  %v177_v0 = vmov 0.0   ;;  %vm178_vm1 = vmmov 0   ;;  %vm63_vm2 = vcmask 523264   ;;  %s227_s1 = inlined_call_operand.vmem [shape: bf16[64,32], index: 1, kind: input, shape index: {}]   ;;  %s228_s0 = inlined_call_operand.vmem [shape: bf16[16,64], index: 0, kind: input, shape index: {}]   ;;  %s229_s2 = inlined_call_operand.vmem [shape: f32[1,32], index: 2, kind: input, shape index: {}]   ;;  %s230_s3 = inlined_call_operand.vmem [shape: bf16[16,32], index: 3, kind: output, shape index: {}]  }
   0x1   :  { %158 = vmatprep.subr.bf16.mxu0 %v177_v0  ;;  %v172_v1 = vld [vmem:[%s227_s1] sm:$0xff]   ;;  %166 = vmatprep.mubr.msk.bf16.mxu0 %vm178_vm1, %v177_v0  ;;  %20 = vst.msk [vmem:[#allocation2] sm:$0xff] %vm19_vm0, %v177_v0  ;;  %21 = vst.msk [vmem:[#allocation2 + $0x8] sm:$0xff] %vm19_vm0, %v177_v0  ;;  %v173_v2 = vld [vmem:[%s227_s1 + $0x8] sm:$0xff]   ;;  %vm135_vm3 = vcmask 257024  }
   0x2   :  { %159 = vmatpush3.bf16.msra.mxu0 %v172_v1  ;;  %v174_v3 = vld [vmem:[%s227_s1 + $0x10] sm:$0xff]   ;;  %v175_v4 = vld [vmem:[%s227_s1 + $0x18] sm:$0xff]   ;;  %v176_v5 = vld [vmem:[%s228_s0] sm:$0xff]  }
   0x3   :  { %160 = vmatprep.subr.bf16.mxu0 %v177_v0  ;;  %v148_v14 = vld [vmem:[%s229_s2] ss:$0 sm:$0xff] }
   0x6   :  { %161 = vmatpush3.bf16.msra.mxu0 %v173_v2 }
   0x7   :  { %162 = vmatprep.subr.bf16.mxu0 %v177_v0 }
   0x8   :  { %v22_v6 = vld [vmem:[#allocation2] sm:$0xff]  ;;  %v23_v8 = vld [vmem:[#allocation2 + $0x8] sm:$0xff] }
   0xa   :  { %163 = vmatpush3.bf16.msra.mxu0 %v174_v3 }
   0xb   :  { %164 = vmatprep.subr.bf16.mxu0 %v177_v0 }
   0xe   :  { %165 = vmatpush3.bf16.msra.mxu0 %v175_v4 }
  0x11   :  { %167 = vmatmul.mubr.msk.bf16.vlgmr.msra.gmra.mrb[0].mxu0 %vm63_vm2, %v176_v5 }
  0xe4   :  { %v101_v7 = vpop.f32.mrb[0].mxu0 }
  0xe5   :  { %v108_v9 = vadd.f32 %v101_v7, %v22_v6  ;;  %v168_v10 = vpop.f32.mrb[1].mxu0 }
  0xe6   :  { %v104_v11 = vpop.f32.mrb[2].mxu0 }
  0xe7   :  { %111 = vst.msk [vmem:[#allocation2] sm:$0xff] %vm19_vm0, %v108_v9  ;;  %v109_v12 = vadd.f32 %v104_v11, %v23_v8  ;;  %v169_v13 = vpop.f32.mrb[3].mxu0 }
  0xe9   :  { %112 = vst.msk [vmem:[#allocation2 + $0x8] sm:$0xff] %vm19_vm0, %v109_v12 }
  0xee   :  { %v116_v15 = vld [vmem:[#allocation2] sm:$0xff] }
  0xef   :  { %v125_v16 = vadd.f32 %v148_v14, %v116_v15 }
  0xf0   :  { %v117_v17 = vld [vmem:[#allocation2 + $0x8] sm:$0xff] }
  0xf1   :  { %v151_v18 = vpack.c.bf16 %v125_v16, %v125_v16  ;;  %v126_v19 = vadd.f32 %v148_v14, %v117_v17 }
  0xf3   :  { %136 = vst.msk [vmem:[%s230_s3] sm:$0xf] %vm135_vm3, %v151_v18  ;;  %v152_v20 = vpack.c.bf16 %v126_v19, %v126_v19 }
  0xf5   :  { %137 = vst.msk [vmem:[%s230_s3 + $0x4] sm:$0xf] %vm135_vm3, %v152_v20 }

// kernel: bert_cnn_forward.21
= control target key start
LH: loop header
LB: loop body
LE: loop exit
PB: predicated region body
PF: predicated region fallthrough
CT: control target
= control target key end

     0   :  { %vm19_vm0 = vcmask 523264   ;;  %v173_v0 = vmov 0.0   ;;  %vm174_vm1 = vmmov 0   ;;  %vm47_vm2 = vcmask 261120   ;;  %s217_s1 = inlined_call_operand.vmem [shape: bf16[32,64], index: 1, kind: input, shape index: {}]   ;;  %s218_s0 = inlined_call_operand.vmem [shape: bf16[16,32], index: 0, kind: input, shape index: {}]   ;;  %s219_s2 = inlined_call_operand.vmem [shape: f32[1,64], index: 2, kind: input, shape index: {}]   ;;  %s220_s3 = inlined_call_operand.vmem [shape: bf16[16,64], index: 3, kind: output, shape index: {}]  }
   0x1   :  { %156 = vmatprep.subr.bf16.mxu0 %v173_v0  ;;  %v166_v1 = vld [vmem:[%s217_s1] sm:$0xff]   ;;  %160 = vmatprep.mubr.msk.bf16.mxu0 %vm174_vm1, %v173_v0  ;;  %20 = vst.msk [vmem:[#allocation2] sm:$0xff] %vm19_vm0, %v173_v0  ;;  %21 = vst.msk [vmem:[#allocation2 + $0x8] sm:$0xff] %vm19_vm0, %v173_v0  ;;  %v167_v2 = vld [vmem:[%s217_s1 + $0x8] sm:$0xff]   ;;  %vm137_vm3 = vcmask 519168  }
   0x2   :  { %157 = vmatpush3.bf16.msra.mxu0 %v166_v1  ;;  %v168_v3 = vld [vmem:[%s218_s0] sm:$0xff]  }
   0x3   :  { %158 = vmatprep.subr.bf16.mxu0 %v173_v0  ;;  %v148_v12 = vld [vmem:[%s219_s2] ss:$0 sm:$0xff] }
   0x6   :  { %159 = vmatpush3.bf16.msra.mxu0 %v167_v2 }
   0x8   :  { %v22_v4 = vld [vmem:[#allocation2] sm:$0xff]  ;;  %v23_v6 = vld [vmem:[#allocation2 + $0x8] sm:$0xff] }
   0x9   :  { %161 = vmatmul.mubr.msk.bf16.vlgmr.msra.gmra.mrb[0].mxu0 %vm47_vm2, %v168_v3 }
  0xdc   :  { %v85_v5 = vpop.f32.mrb[0].mxu0 }
  0xdd   :  { %v92_v7 = vadd.f32 %v85_v5, %v22_v4  ;;  %v162_v8 = vpop.f32.mrb[1].mxu0 }
  0xde   :  { %v88_v9 = vpop.f32.mrb[2].mxu0 }
  0xdf   :  { %95 = vst.msk [vmem:[#allocation2] sm:$0xff] %vm19_vm0, %v92_v7  ;;  %v93_v10 = vadd.f32 %v88_v9, %v23_v6  ;;  %v163_v11 = vpop.f32.mrb[3].mxu0 }
  0xe1   :  { %96 = vst.msk [vmem:[#allocation2 + $0x8] sm:$0xff] %vm19_vm0, %v93_v10 }
  0xe6   :  { %v100_v13 = vld [vmem:[#allocation2] sm:$0xff] }
  0xe7   :  { %v109_v14 = vadd.f32 %v148_v12, %v100_v13 }
  0xe8   :  { %v101_v15 = vld [vmem:[#allocation2 + $0x8] sm:$0xff] }
  0xe9   :  { %v111_v16 = vmul.f32 %v109_v14, %v109_v14  ;;  %v110_v17 = vadd.f32 %v148_v12, %v101_v15 }
  0xeb   :  { %v113_v18 = vmul.f32 %v111_v16, %v109_v14  ;;  %v112_v19 = vmul.f32 %v110_v17, %v110_v17 }
  0xed   :  { %v115_v20 = vmul.f32 0.044715, %v113_v18  ;;  %v114_v21 = vmul.f32 %v112_v19, %v110_v17 }
  0xef   :  { %v117_v22 = vadd.f32 %v115_v20, %v109_v14  ;;  %v116_v23 = vmul.f32 0.044715, %v114_v21 }
  0xf1   :  { %v119_v24 = vmul.f32 0.7978846, %v117_v22  ;;  %v118_v25 = vadd.f32 %v116_v23, %v110_v17 }
  0xf3   :  { %169 = vtanh.f32 %v119_v24  ;;  %v120_v26 = vmul.f32 0.7978846, %v118_v25 }
  0xf5   :  { %171 = vtanh.f32 %v120_v26 }
  0xfd   :  { %v170_v27 = vpop.eup %169 }
  0xfe   :  { %v123_v28 = vadd.f32 1.0, %v170_v27 }
  0xff   :  { %v172_v29 = vpop.eup %171 }
 0x100   :  { %v125_v30 = vmul.f32 0.5, %v123_v28  ;;  %v124_v31 = vadd.f32 1.0, %v172_v29 }
 0x102   :  { %v127_v32 = vmul.f32 %v125_v30, %v109_v14  ;;  %v126_v33 = vmul.f32 0.5, %v124_v31 }
 0x104   :  { %v151_v34 = vpack.c.bf16 %v127_v32, %v127_v32  ;;  %v128_v35 = vmul.f32 %v126_v33, %v110_v17 }
 0x106   :  { %138 = vst.msk [vmem:[%s220_s3] sm:$0xf] %vm137_vm3, %v151_v34  ;;  %v152_v36 = vpack.c.bf16 %v128_v35, %v128_v35 }
 0x108   :  { %139 = vst.msk [vmem:[%s220_s3 + $0x4] sm:$0xf] %vm137_vm3, %v152_v36 }

</bundles_post_ra>
